<compile_context>
chip_gen: v7x
topology: tpu7x:2x2x1
jax: 0.10.0
libtpu: 0.0.40
codegen_flags: <defaults>
</compile_context>

<pallas_src>
import functools

import jax
import jax.numpy as jnp
from jax import lax
from jax.experimental import pallas as pl
from jax.experimental.pallas import tpu as pltpu

EPS = 1e-5


# --------------------------------------------------------------------------------------
# In-kernel helpers (all operate on lane-dense slabs, minor dim = W*C)
# --------------------------------------------------------------------------------------
def _im2col_slab(x, W, C):
    """x: (N, H, W*C) slab.  Returns (N*H, 9*W*C): tap-major concat of the 9 shifted
    slabs (zero-padded 'SAME' borders).  h-shift = sublane shift, w-shift = lane shift."""
    N, H, WC = x.shape
    zrow = jnp.zeros((N, 1, WC), x.dtype)
    zcol = jnp.zeros((N, H, C), x.dtype)
    taps = []
    for dh in (-1, 0, 1):
        if dh == -1:      # shifted[n, h] = x[n, h-1]; row 0 reads the zero pad
            xh = jnp.concatenate([zrow, x[:, :H - 1, :]], axis=1)
        elif dh == 1:     # shifted[n, h] = x[n, h+1]; row H-1 reads the zero pad
            xh = jnp.concatenate([x[:, 1:, :], zrow], axis=1)
        else:
            xh = x
        for dw in (-1, 0, 1):
            if dw == -1:  # block w reads block w-1; block 0 reads the zero pad
                xw = jnp.concatenate([zcol, xh[:, :, :WC - C]], axis=2)
            elif dw == 1:
                xw = jnp.concatenate([xh[:, :, C:], zcol], axis=2)
            else:
                xw = xh
            taps.append(xw)
    return jnp.concatenate(taps, axis=2).reshape(N * H, 9 * WC)


def _lane_block_total(s, C, W):
    """s: (1, W*C) f32.  Returns (1, W*C) where lane w*C+c = sum_{w'} s[0, w'*C + c]
    (per-channel total, already tiled back to slab width).  Roll-and-add tree on the
    XLU; exact f32 adds (no MXU rounding of the statistics)."""
    if W & (W - 1) == 0:                      # power-of-two W: log2(W) rolls
        total = s
        shift = C
        while shift < W * C:
            total = total + pltpu.roll(total, shift, axis=1)
            shift *= 2
        return total
    total = s                                  # general W: W-1 rolls (toy fallback)
    for m in range(1, W):
        total = total + pltpu.roll(s, m * C, axis=1)
    return total


def _bn_relu_slab(acc, gamma_t, beta_t, C, W, count):
    """Train-mode BatchNorm + ReLU on a lane-dense (rows, W*C) f32 slab.
    gamma_t/beta_t: (1, W*C) per-channel affine params pre-tiled W times.
    Two-pass batch statistics (mean, then E[(x-mean)^2])."""
    inv = 1.0 / count
    mean = _lane_block_total(jnp.sum(acc, axis=0, keepdims=True), C, W) * inv
    d = acc - mean
    var = _lane_block_total(jnp.sum(d * d, axis=0, keepdims=True), C, W) * inv
    y = d * lax.rsqrt(var + EPS) * gamma_t + beta_t
    return jnp.maximum(y, 0.0)


def _double_conv_kernel(x_ref, w1_ref, g1_ref, b1_ref, w2_ref, g2_ref, b2_ref, o_ref, *, W):
    # x_ref:  (N, H, W*Cin)        bf16 lane-dense input slab (unpadded; borders handled
    #                              inside _im2col_slab)
    # w*_ref: (9*W*Cin, W*Cmid) / (9*W*Cmid, W*Cout) bf16 block-diagonal-per-w weights
    #         (no conv bias: cancelled exactly by the train-mode BatchNorm that follows)
    # g*/b*:  (1, W*C) f32 BatchNorm affine params, pre-tiled to slab width
    # o_ref:  (N, H, W*Cout) f32 lane-dense output slab
    N, H, WCin = x_ref.shape
    WCmid = w1_ref.shape[1]
    WCout = w2_ref.shape[1]
    Cin, Cmid, Cout = WCin // W, WCmid // W, WCout // W
    M = N * H * W

    # ---- conv1: register im2col + single bf16 MXU matmul, output already slab-dense ----
    x = x_ref[...]                                            # (N, H, W*Cin) bf16
    l1 = _im2col_slab(x, W, Cin)                              # (N*H, 9*W*Cin) bf16
    acc1 = jnp.dot(l1, w1_ref[...], preferred_element_type=jnp.float32)   # (N*H, W*Cmid)

    # ---- BN1 (two-pass batch stats) + ReLU, fully lane-dense ----
    y1 = _bn_relu_slab(acc1, g1_ref[...], b1_ref[...], Cmid, W, M)

    # ---- conv2: same scheme on the mid slab ----
    l2 = _im2col_slab(y1.astype(jnp.bfloat16).reshape(N, H, WCmid), W, Cmid)
    acc2 = jnp.dot(l2, w2_ref[...], preferred_element_type=jnp.float32)   # (N*H, W*Cout)

    # ---- BN2 + ReLU + single dense store ----
    y2 = _bn_relu_slab(acc2, g2_ref[...], b2_ref[...], Cout, W, M)
    o_ref[...] = y2.reshape(N, H, WCout)


# --------------------------------------------------------------------------------------
# Wrapper (layout plumbing only)
# --------------------------------------------------------------------------------------
def _expand_weight(w_flat, W):
    """Compact im2col weights (9*Cin, Cout) [row = (kh*3+kw)*Cin + ci] ->
    block-diagonal-per-w matrix (9*W*Cin, W*Cout) matching the slab im2col layout."""
    KC, Cout = w_flat.shape
    Cin = KC // 9
    w9 = w_flat.reshape(9, Cin, Cout)
    eye = jnp.eye(W, dtype=w_flat.dtype)
    big = jnp.einsum('tio,wv->twivo', w9, eye)            # exact (0/1 scaling)
    return big.reshape(9 * W * Cin, W * Cout)


def double_conv_pallas(x_nchw, params):
    (w1, b1, g1, bt1, w2, b2, g2, bt2) = params
    del b1, b2  # exactly cancelled by the train-mode BatchNorm that follows each conv
    N, Cin, H, W = x_nchw.shape
    Cmid = w1.shape[-1]
    Cout = w2.shape[-1]

    # lane-dense bf16 input slab: (N, H, W*Cin)
    x_slab = jnp.transpose(x_nchw, (0, 2, 3, 1)).reshape(N, H, W * Cin).astype(jnp.bfloat16)
    # block-diagonal-per-w bf16 weights (conv output lands directly in slab layout)
    w1_big = _expand_weight(w1.astype(jnp.bfloat16), W)   # (9*W*Cin,  W*Cmid)
    w2_big = _expand_weight(w2.astype(jnp.bfloat16), W)   # (9*W*Cmid, W*Cout)
    # BN affine params pre-tiled to slab width
    g1t = jnp.tile(g1, W).reshape(1, W * Cmid)
    b1t = jnp.tile(bt1, W).reshape(1, W * Cmid)
    g2t = jnp.tile(g2, W).reshape(1, W * Cout)
    b2t = jnp.tile(bt2, W).reshape(1, W * Cout)

    vspec = pl.BlockSpec(memory_space=pltpu.MemorySpace.VMEM)
    # TODO(synk): for production shapes (C >= 128, large H/W), switch back to compact
    # (9*C, Cout) weights + a halo-tiled grid over (N, H) with two-phase BN statistics
    # (stats-accumulate pass + normalize pass), dimension_semantics=("parallel", ...) and
    # an explicit vmem_limit_bytes; train-mode BN's *global* batch stats prevent a
    # single-pass spatially tiled kernel.  The toy shapes here fit one invocation.
    out = pl.pallas_call(
        functools.partial(_double_conv_kernel, W=W),
        out_shape=jax.ShapeDtypeStruct((N, H, W * Cout), jnp.float32),
        in_specs=[vspec] * 7,
        out_specs=vspec,
    )(x_slab, w1_big, g1t, b1t, w2_big, g2t, b2t)

    # layout plumbing only: un-fuse the lane-dense slab and return NCHW
    return jnp.transpose(out.reshape(N, H, W, Cout), (0, 3, 1, 2))


# --------------------------------------------------------------------------------------
# Params / reference
# --------------------------------------------------------------------------------------
def init_params(key, in_channels, out_channels, mid_channels=None):
    """PyTorch-style init; conv weights pre-flattened to the im2col layout (9*Cin, Cout)."""
    if not mid_channels:
        mid_channels = out_channels
    k1, k2, k3, k4 = jax.random.split(key, 4)

    def conv_init(kw_key, kb_key, cin, cout):
        bound = 1.0 / jnp.sqrt(cin * 9.0)
        w_oihw = jax.random.uniform(kw_key, (cout, cin, 3, 3), jnp.float32, -bound, bound)
        b = jax.random.uniform(kb_key, (cout,), jnp.float32, -bound, bound)
        # (Cout,Cin,3,3) -> (kh,kw,Cin,Cout) -> (9*Cin, Cout); row = (kh*3+kw)*Cin + ci.
        w = jnp.transpose(w_oihw, (2, 3, 1, 0)).reshape(9 * cin, cout)
        return w, b

    w1, b1 = conv_init(k1, k2, in_channels, mid_channels)
    w2, b2 = conv_init(k3, k4, mid_channels, out_channels)
    g1 = jnp.ones((mid_channels,), jnp.float32)
    bt1 = jnp.zeros((mid_channels,), jnp.float32)
    g2 = jnp.ones((out_channels,), jnp.float32)
    bt2 = jnp.zeros((out_channels,), jnp.float32)
    return (w1, b1, g1, bt1, w2, b2, g2, bt2)


def double_conv_ref(x_nchw, params, matmul_dtype=jnp.float32):
    """Pure-JAX reference matching the PyTorch forward (train-mode BN, conv bias included).

    matmul_dtype=jnp.bfloat16 reproduces the kernel's bf16 MXU-input rounding (f32 accum).
    """
    (w1, b1, g1, bt1, w2, b2, g2, bt2) = params
    x = jnp.transpose(x_nchw, (0, 2, 3, 1))
    dn = ('NHWC', 'HWIO', 'NHWC')

    def block(y, w, b, g, bt):
        cin, cout = w.shape[0] // 9, w.shape[1]
        w_hwio = w.reshape(3, 3, cin, cout)
        y = lax.conv_general_dilated(
            y.astype(matmul_dtype), w_hwio.astype(matmul_dtype), (1, 1), 'SAME',
            dimension_numbers=dn, preferred_element_type=jnp.float32) + b
        mean = jnp.mean(y, axis=(0, 1, 2))
        var = jnp.var(y, axis=(0, 1, 2))
        y = (y - mean) * lax.rsqrt(var + EPS) * g + bt
        return jnp.maximum(y, 0.0)

    y = block(x, w1, b1, g1, bt1)
    y = block(y, w2, b2, g2, bt2)
    return jnp.transpose(y, (0, 3, 1, 2))


if __name__ == "__main__":
    key = jax.random.PRNGKey(0)
    kx, kp = jax.random.split(key)

    N, Cin, H, W = 2, 4, 16, 16
    Cout = 8
    x = jax.random.normal(kx, (N, Cin, H, W), jnp.float32)
    params = init_params(kp, Cin, Cout)

    out = jax.jit(double_conv_pallas)(x, params)
    out = jax.block_until_ready(out)
    assert out.shape == (N, Cout, H, W), out.shape

    # Tight check: reference with the same bf16 MXU-input rounding as the kernel.
    ref_bf16 = double_conv_ref(x, params, matmul_dtype=jnp.bfloat16)
    err_tight = float(jnp.max(jnp.abs(out - ref_bf16)))
    assert err_tight < 5e-3, err_tight

    # Loose check: full-f32 reference; difference is bf16 rounding of the MXU inputs only.
    ref_f32 = double_conv_ref(x, params)
    err_f32 = float(jnp.max(jnp.abs(out - ref_f32)))
    assert err_f32 < 5e-2, err_f32

    print("KERNEL_OK")
</pallas_src>

<mosaic_0001>
module attributes {stable_mosaic.version = 11 : i64} {
  func.func @_double_conv_kernel(%arg0: memref<2x16x64xbf16, #tpu.memory_space<vmem>>, %arg1: memref<576x128xbf16, #tpu.memory_space<vmem>>, %arg2: memref<1x128xf32, #tpu.memory_space<vmem>>, %arg3: memref<1x128xf32, #tpu.memory_space<vmem>>, %arg4: memref<1152x128xbf16, #tpu.memory_space<vmem>>, %arg5: memref<1x128xf32, #tpu.memory_space<vmem>>, %arg6: memref<1x128xf32, #tpu.memory_space<vmem>>, %arg7: memref<2x16x128xf32, #tpu.memory_space<vmem>>) attributes {dimension_semantics = [], scalar_prefetch = 0 : i64, scratch_operands = 0 : i64, tpu.core_type = #tpu.core_type<tc>} {
    %c0 = arith.constant 0 : index
    %c0_0 = arith.constant 0 : index
    %c0_1 = arith.constant 0 : index
    %0 = vector.load %arg0[%c0, %c0_0, %c0_1] : memref<2x16x64xbf16, #tpu.memory_space<vmem>>, vector<2x16x64xbf16>
    %cst = arith.constant 0.000000e+00 : bf16
    %1 = vector.broadcast %cst : bf16 to vector<2x1x64xbf16>
    %cst_2 = arith.constant 0.000000e+00 : bf16
    %2 = vector.broadcast %cst_2 : bf16 to vector<2x16x4xbf16>
    %3 = vector.extract_strided_slice %0 {offsets = [0, 0, 0], sizes = [2, 15, 64], strides = [1, 1, 1]} : vector<2x16x64xbf16> to vector<2x15x64xbf16>
    %4 = tpu.concatenate %1, %3 in 1 : vector<2x1x64xbf16>, vector<2x15x64xbf16> -> vector<2x16x64xbf16>
    %5 = vector.extract_strided_slice %4 {offsets = [0, 0, 0], sizes = [2, 16, 60], strides = [1, 1, 1]} : vector<2x16x64xbf16> to vector<2x16x60xbf16>
    %6 = tpu.concatenate %2, %5 in 2 : vector<2x16x4xbf16>, vector<2x16x60xbf16> -> vector<2x16x64xbf16>
    %7 = vector.extract_strided_slice %4 {offsets = [0, 0, 4], sizes = [2, 16, 60], strides = [1, 1, 1]} : vector<2x16x64xbf16> to vector<2x16x60xbf16>
    %8 = tpu.concatenate %7, %2 in 2 : vector<2x16x60xbf16>, vector<2x16x4xbf16> -> vector<2x16x64xbf16>
    %9 = vector.extract_strided_slice %0 {offsets = [0, 0, 0], sizes = [2, 16, 60], strides = [1, 1, 1]} : vector<2x16x64xbf16> to vector<2x16x60xbf16>
    %10 = tpu.concatenate %2, %9 in 2 : vector<2x16x4xbf16>, vector<2x16x60xbf16> -> vector<2x16x64xbf16>
    %11 = vector.extract_strided_slice %0 {offsets = [0, 0, 4], sizes = [2, 16, 60], strides = [1, 1, 1]} : vector<2x16x64xbf16> to vector<2x16x60xbf16>
    %12 = tpu.concatenate %11, %2 in 2 : vector<2x16x60xbf16>, vector<2x16x4xbf16> -> vector<2x16x64xbf16>
    %13 = vector.extract_strided_slice %0 {offsets = [0, 1, 0], sizes = [2, 15, 64], strides = [1, 1, 1]} : vector<2x16x64xbf16> to vector<2x15x64xbf16>
    %14 = tpu.concatenate %13, %1 in 1 : vector<2x15x64xbf16>, vector<2x1x64xbf16> -> vector<2x16x64xbf16>
    %15 = vector.extract_strided_slice %14 {offsets = [0, 0, 0], sizes = [2, 16, 60], strides = [1, 1, 1]} : vector<2x16x64xbf16> to vector<2x16x60xbf16>
    %16 = tpu.concatenate %2, %15 in 2 : vector<2x16x4xbf16>, vector<2x16x60xbf16> -> vector<2x16x64xbf16>
    %17 = vector.extract_strided_slice %14 {offsets = [0, 0, 4], sizes = [2, 16, 60], strides = [1, 1, 1]} : vector<2x16x64xbf16> to vector<2x16x60xbf16>
    %18 = tpu.concatenate %17, %2 in 2 : vector<2x16x60xbf16>, vector<2x16x4xbf16> -> vector<2x16x64xbf16>
    %19 = tpu.concatenate %6, %4, %8, %10, %0, %12, %16, %14, %18 in 2 : vector<2x16x64xbf16>, vector<2x16x64xbf16>, vector<2x16x64xbf16>, vector<2x16x64xbf16>, vector<2x16x64xbf16>, vector<2x16x64xbf16>, vector<2x16x64xbf16>, vector<2x16x64xbf16>, vector<2x16x64xbf16> -> vector<2x16x576xbf16>
    %20 = vector.shape_cast %19 : vector<2x16x576xbf16> to vector<32x576xbf16>
    %c0_3 = arith.constant 0 : index
    %c0_4 = arith.constant 0 : index
    %21 = vector.load %arg1[%c0_3, %c0_4] : memref<576x128xbf16, #tpu.memory_space<vmem>>, vector<576x128xbf16>
    %cst_5 = arith.constant dense<0.000000e+00> : vector<32x128xf32>
    %22 = tpu.matmul %20, %21, %cst_5 {dimension_numbers = #tpu.dot_dimension_numbers<[1], [0], [0], [1], [0, 0, 1, 1], [], []>} : vector<32x576xbf16>, vector<576x128xbf16>, vector<32x128xf32> -> vector<32x128xf32>
    %c0_6 = arith.constant 0 : index
    %c0_7 = arith.constant 0 : index
    %23 = vector.load %arg2[%c0_6, %c0_7] : memref<1x128xf32, #tpu.memory_space<vmem>>, vector<1x128xf32>
    %c0_8 = arith.constant 0 : index
    %c0_9 = arith.constant 0 : index
    %24 = vector.load %arg3[%c0_8, %c0_9] : memref<1x128xf32, #tpu.memory_space<vmem>>, vector<1x128xf32>
    %cst_10 = arith.constant dense<0.000000e+00> : vector<128xf32>
    %25 = vector.multi_reduction <add>, %22, %cst_10 [0] : vector<32x128xf32> to vector<128xf32>
    %26 = vector.shape_cast %25 : vector<128xf32> to vector<1x128xf32>
    %c8_i32 = arith.constant 8 : i32
    %27 = tpu.dynamic_rotate %26 by %c8_i32 dim 1 : vector<1x128xf32>, i32 -> vector<1x128xf32>
    %28 = arith.addf %26, %27 : vector<1x128xf32>
    %c16_i32 = arith.constant 16 : i32
    %29 = tpu.dynamic_rotate %28 by %c16_i32 dim 1 : vector<1x128xf32>, i32 -> vector<1x128xf32>
    %30 = arith.addf %28, %29 : vector<1x128xf32>
    %c32_i32 = arith.constant 32 : i32
    %31 = tpu.dynamic_rotate %30 by %c32_i32 dim 1 : vector<1x128xf32>, i32 -> vector<1x128xf32>
    %32 = arith.addf %30, %31 : vector<1x128xf32>
    %c64_i32 = arith.constant 64 : i32
    %33 = tpu.dynamic_rotate %32 by %c64_i32 dim 1 : vector<1x128xf32>, i32 -> vector<1x128xf32>
    %34 = arith.addf %32, %33 : vector<1x128xf32>
    %cst_11 = arith.constant 0.001953125 : f32
    %35 = vector.broadcast %cst_11 : f32 to vector<1x128xf32>
    %36 = arith.mulf %34, %35 : vector<1x128xf32>
    %37 = vector.broadcast %36 : vector<1x128xf32> to vector<32x128xf32>
    %38 = arith.subf %22, %37 : vector<32x128xf32>
    %39 = arith.mulf %38, %38 : vector<32x128xf32>
    %cst_12 = arith.constant dense<0.000000e+00> : vector<128xf32>
    %40 = vector.multi_reduction <add>, %39, %cst_12 [0] : vector<32x128xf32> to vector<128xf32>
    %41 = vector.shape_cast %40 : vector<128xf32> to vector<1x128xf32>
    %c8_i32_13 = arith.constant 8 : i32
    %42 = tpu.dynamic_rotate %41 by %c8_i32_13 dim 1 : vector<1x128xf32>, i32 -> vector<1x128xf32>
    %43 = arith.addf %41, %42 : vector<1x128xf32>
    %c16_i32_14 = arith.constant 16 : i32
    %44 = tpu.dynamic_rotate %43 by %c16_i32_14 dim 1 : vector<1x128xf32>, i32 -> vector<1x128xf32>
    %45 = arith.addf %43, %44 : vector<1x128xf32>
    %c32_i32_15 = arith.constant 32 : i32
    %46 = tpu.dynamic_rotate %45 by %c32_i32_15 dim 1 : vector<1x128xf32>, i32 -> vector<1x128xf32>
    %47 = arith.addf %45, %46 : vector<1x128xf32>
    %c64_i32_16 = arith.constant 64 : i32
    %48 = tpu.dynamic_rotate %47 by %c64_i32_16 dim 1 : vector<1x128xf32>, i32 -> vector<1x128xf32>
    %49 = arith.addf %47, %48 : vector<1x128xf32>
    %cst_17 = arith.constant 0.001953125 : f32
    %50 = vector.broadcast %cst_17 : f32 to vector<1x128xf32>
    %51 = arith.mulf %49, %50 : vector<1x128xf32>
    %cst_18 = arith.constant 9.99999974E-6 : f32
    %52 = vector.broadcast %cst_18 : f32 to vector<1x128xf32>
    %53 = arith.addf %51, %52 : vector<1x128xf32>
    %54 = math.rsqrt %53 : vector<1x128xf32>
    %55 = vector.broadcast %54 : vector<1x128xf32> to vector<32x128xf32>
    %56 = arith.mulf %38, %55 : vector<32x128xf32>
    %57 = vector.broadcast %23 : vector<1x128xf32> to vector<32x128xf32>
    %58 = arith.mulf %56, %57 : vector<32x128xf32>
    %59 = vector.broadcast %24 : vector<1x128xf32> to vector<32x128xf32>
    %60 = arith.addf %58, %59 : vector<32x128xf32>
    %cst_19 = arith.constant 0.000000e+00 : f32
    %61 = vector.broadcast %cst_19 : f32 to vector<32x128xf32>
    %62 = arith.maximumf %60, %61 : vector<32x128xf32>
    %63 = arith.truncf %62 : vector<32x128xf32> to vector<32x128xbf16>
    %64 = vector.shape_cast %63 : vector<32x128xbf16> to vector<2x16x128xbf16>
    %cst_20 = arith.constant 0.000000e+00 : bf16
    %65 = vector.broadcast %cst_20 : bf16 to vector<2x1x128xbf16>
    %cst_21 = arith.constant 0.000000e+00 : bf16
    %66 = vector.broadcast %cst_21 : bf16 to vector<2x16x8xbf16>
    %67 = vector.extract_strided_slice %64 {offsets = [0, 0, 0], sizes = [2, 15, 128], strides = [1, 1, 1]} : vector<2x16x128xbf16> to vector<2x15x128xbf16>
    %68 = tpu.concatenate %65, %67 in 1 : vector<2x1x128xbf16>, vector<2x15x128xbf16> -> vector<2x16x128xbf16>
    %69 = vector.extract_strided_slice %68 {offsets = [0, 0, 0], sizes = [2, 16, 120], strides = [1, 1, 1]} : vector<2x16x128xbf16> to vector<2x16x120xbf16>
    %70 = tpu.concatenate %66, %69 in 2 : vector<2x16x8xbf16>, vector<2x16x120xbf16> -> vector<2x16x128xbf16>
    %71 = vector.extract_strided_slice %68 {offsets = [0, 0, 8], sizes = [2, 16, 120], strides = [1, 1, 1]} : vector<2x16x128xbf16> to vector<2x16x120xbf16>
    %72 = tpu.concatenate %71, %66 in 2 : vector<2x16x120xbf16>, vector<2x16x8xbf16> -> vector<2x16x128xbf16>
    %73 = vector.extract_strided_slice %64 {offsets = [0, 0, 0], sizes = [2, 16, 120], strides = [1, 1, 1]} : vector<2x16x128xbf16> to vector<2x16x120xbf16>
    %74 = tpu.concatenate %66, %73 in 2 : vector<2x16x8xbf16>, vector<2x16x120xbf16> -> vector<2x16x128xbf16>
    %75 = vector.extract_strided_slice %64 {offsets = [0, 0, 8], sizes = [2, 16, 120], strides = [1, 1, 1]} : vector<2x16x128xbf16> to vector<2x16x120xbf16>
    %76 = tpu.concatenate %75, %66 in 2 : vector<2x16x120xbf16>, vector<2x16x8xbf16> -> vector<2x16x128xbf16>
    %77 = vector.extract_strided_slice %64 {offsets = [0, 1, 0], sizes = [2, 15, 128], strides = [1, 1, 1]} : vector<2x16x128xbf16> to vector<2x15x128xbf16>
    %78 = tpu.concatenate %77, %65 in 1 : vector<2x15x128xbf16>, vector<2x1x128xbf16> -> vector<2x16x128xbf16>
    %79 = vector.extract_strided_slice %78 {offsets = [0, 0, 0], sizes = [2, 16, 120], strides = [1, 1, 1]} : vector<2x16x128xbf16> to vector<2x16x120xbf16>
    %80 = tpu.concatenate %66, %79 in 2 : vector<2x16x8xbf16>, vector<2x16x120xbf16> -> vector<2x16x128xbf16>
    %81 = vector.extract_strided_slice %78 {offsets = [0, 0, 8], sizes = [2, 16, 120], strides = [1, 1, 1]} : vector<2x16x128xbf16> to vector<2x16x120xbf16>
    %82 = tpu.concatenate %81, %66 in 2 : vector<2x16x120xbf16>, vector<2x16x8xbf16> -> vector<2x16x128xbf16>
    %83 = tpu.concatenate %70, %68, %72, %74, %64, %76, %80, %78, %82 in 2 : vector<2x16x128xbf16>, vector<2x16x128xbf16>, vector<2x16x128xbf16>, vector<2x16x128xbf16>, vector<2x16x128xbf16>, vector<2x16x128xbf16>, vector<2x16x128xbf16>, vector<2x16x128xbf16>, vector<2x16x128xbf16> -> vector<2x16x1152xbf16>
    %84 = vector.shape_cast %83 : vector<2x16x1152xbf16> to vector<32x1152xbf16>
    %c0_22 = arith.constant 0 : index
    %c0_23 = arith.constant 0 : index
    %85 = vector.load %arg4[%c0_22, %c0_23] : memref<1152x128xbf16, #tpu.memory_space<vmem>>, vector<1152x128xbf16>
    %cst_24 = arith.constant dense<0.000000e+00> : vector<32x128xf32>
    %86 = tpu.matmul %84, %85, %cst_24 {dimension_numbers = #tpu.dot_dimension_numbers<[1], [0], [0], [1], [0, 0, 1, 1], [], []>} : vector<32x1152xbf16>, vector<1152x128xbf16>, vector<32x128xf32> -> vector<32x128xf32>
    %c0_25 = arith.constant 0 : index
    %c0_26 = arith.constant 0 : index
    %87 = vector.load %arg5[%c0_25, %c0_26] : memref<1x128xf32, #tpu.memory_space<vmem>>, vector<1x128xf32>
    %c0_27 = arith.constant 0 : index
    %c0_28 = arith.constant 0 : index
    %88 = vector.load %arg6[%c0_27, %c0_28] : memref<1x128xf32, #tpu.memory_space<vmem>>, vector<1x128xf32>
    %cst_29 = arith.constant dense<0.000000e+00> : vector<128xf32>
    %89 = vector.multi_reduction <add>, %86, %cst_29 [0] : vector<32x128xf32> to vector<128xf32>
    %90 = vector.shape_cast %89 : vector<128xf32> to vector<1x128xf32>
    %c8_i32_30 = arith.constant 8 : i32
    %91 = tpu.dynamic_rotate %90 by %c8_i32_30 dim 1 : vector<1x128xf32>, i32 -> vector<1x128xf32>
    %92 = arith.addf %90, %91 : vector<1x128xf32>
    %c16_i32_31 = arith.constant 16 : i32
    %93 = tpu.dynamic_rotate %92 by %c16_i32_31 dim 1 : vector<1x128xf32>, i32 -> vector<1x128xf32>
    %94 = arith.addf %92, %93 : vector<1x128xf32>
    %c32_i32_32 = arith.constant 32 : i32
    %95 = tpu.dynamic_rotate %94 by %c32_i32_32 dim 1 : vector<1x128xf32>, i32 -> vector<1x128xf32>
    %96 = arith.addf %94, %95 : vector<1x128xf32>
    %c64_i32_33 = arith.constant 64 : i32
    %97 = tpu.dynamic_rotate %96 by %c64_i32_33 dim 1 : vector<1x128xf32>, i32 -> vector<1x128xf32>
    %98 = arith.addf %96, %97 : vector<1x128xf32>
    %cst_34 = arith.constant 0.001953125 : f32
    %99 = vector.broadcast %cst_34 : f32 to vector<1x128xf32>
    %100 = arith.mulf %98, %99 : vector<1x128xf32>
    %101 = vector.broadcast %100 : vector<1x128xf32> to vector<32x128xf32>
    %102 = arith.subf %86, %101 : vector<32x128xf32>
    %103 = arith.mulf %102, %102 : vector<32x128xf32>
    %cst_35 = arith.constant dense<0.000000e+00> : vector<128xf32>
    %104 = vector.multi_reduction <add>, %103, %cst_35 [0] : vector<32x128xf32> to vector<128xf32>
    %105 = vector.shape_cast %104 : vector<128xf32> to vector<1x128xf32>
    %c8_i32_36 = arith.constant 8 : i32
    %106 = tpu.dynamic_rotate %105 by %c8_i32_36 dim 1 : vector<1x128xf32>, i32 -> vector<1x128xf32>
    %107 = arith.addf %105, %106 : vector<1x128xf32>
    %c16_i32_37 = arith.constant 16 : i32
    %108 = tpu.dynamic_rotate %107 by %c16_i32_37 dim 1 : vector<1x128xf32>, i32 -> vector<1x128xf32>
    %109 = arith.addf %107, %108 : vector<1x128xf32>
    %c32_i32_38 = arith.constant 32 : i32
    %110 = tpu.dynamic_rotate %109 by %c32_i32_38 dim 1 : vector<1x128xf32>, i32 -> vector<1x128xf32>
    %111 = arith.addf %109, %110 : vector<1x128xf32>
    %c64_i32_39 = arith.constant 64 : i32
    %112 = tpu.dynamic_rotate %111 by %c64_i32_39 dim 1 : vector<1x128xf32>, i32 -> vector<1x128xf32>
    %113 = arith.addf %111, %112 : vector<1x128xf32>
    %cst_40 = arith.constant 0.001953125 : f32
    %114 = vector.broadcast %cst_40 : f32 to vector<1x128xf32>
    %115 = arith.mulf %113, %114 : vector<1x128xf32>
    %cst_41 = arith.constant 9.99999974E-6 : f32
    %116 = vector.broadcast %cst_41 : f32 to vector<1x128xf32>
    %117 = arith.addf %115, %116 : vector<1x128xf32>
    %118 = math.rsqrt %117 : vector<1x128xf32>
    %119 = vector.broadcast %118 : vector<1x128xf32> to vector<32x128xf32>
    %120 = arith.mulf %102, %119 : vector<32x128xf32>
    %121 = vector.broadcast %87 : vector<1x128xf32> to vector<32x128xf32>
    %122 = arith.mulf %120, %121 : vector<32x128xf32>
    %123 = vector.broadcast %88 : vector<1x128xf32> to vector<32x128xf32>
    %124 = arith.addf %122, %123 : vector<32x128xf32>
    %cst_42 = arith.constant 0.000000e+00 : f32
    %125 = vector.broadcast %cst_42 : f32 to vector<32x128xf32>
    %126 = arith.maximumf %124, %125 : vector<32x128xf32>
    %127 = vector.shape_cast %126 : vector<32x128xf32> to vector<2x16x128xf32>
    %c0_43 = arith.constant 0 : index
    %c0_44 = arith.constant 0 : index
    %c0_45 = arith.constant 0 : index
    %128 = vector.load %arg7[%c0_43, %c0_44, %c0_45] : memref<2x16x128xf32, #tpu.memory_space<vmem>>, vector<2x16x128xf32>
    tpu.vector_store %arg7[%c0_43, %c0_44, %c0_45], %127 {strides = array<i32>} : memref<2x16x128xf32, #tpu.memory_space<vmem>>, vector<2x16x128xf32>,
    return
  }
}

</mosaic_0001>

<bundles_post_ra>
// kernel: tile.23
= control target key start
LH: loop header
LB: loop body
LE: loop exit
PB: predicated region body
PF: predicated region fallthrough
CT: control target
= control target key end

     0   :  { %s28_s0 = inlined_call_operand.vmem [shape: f32[8], index: 0, kind: input, shape index: {}]   ;;  %s29_s1 = inlined_call_operand.vmem [shape: f32[16,8], index: 1, kind: output, shape index: {}]  }
   0x1   :  { %v4_v0 = vld [vmem:[%s28_s0] ss:$0 sm:$0xff] }
   0x2   :  { %5 = vst [vmem:[%s29_s1] sm:$0xff] %v4_v0  ;;  %8 = vst [vmem:[%s29_s1 + $0x8] sm:$0xff] %v4_v0 }

// kernel: tile.24
= control target key start
LH: loop header
LB: loop body
LE: loop exit
PB: predicated region body
PF: predicated region fallthrough
CT: control target
= control target key end

     0   :  { %s131_s10 = smov 120   ;;  %s132_s11 = smov 104   ;;  %vm3_vm0 = vcmask 64512   ;;  %vm9_vm1 = vcmask 1048512   ;;  %vm15_vm2 = vcmask 982912   ;;  %vm21_vm3 = vcmask 917312   ;;  %s207_s0 = inlined_call_operand.vmem [shape: f32[16,8], index: 0, kind: input, shape index: {}]   ;;  %s208_s1 = inlined_call_operand.vmem [shape: f32[1,128], index: 1, kind: output, shape index: {}]  }
   0x1   :  { %v101_v0 = vld [vmem:[%s207_s0 + $0xf] sm:$0x1]   ;;  %v103_v1 = vld [vmem:[%s207_s0 + $0xd] sm:$0x1]   ;;  %v102_v2 = vld [vmem:[%s207_s0 + $0xe] sm:$0x1]  }
   0x2   :  { %7 = vrot.lane.b32.xlu0 %v101_v0, %s131_s10  ;;  %19 = vrot.lane.b32.xlu1 %v103_v1, %s132_s11  ;;  %v104_v3 = vld [vmem:[%s207_s0 + $0xc] sm:$0x1]   ;;  %s133_s16 = smov 112   ;;  %s134_s17 = smov 96   ;;  %v105_v4 = vld [vmem:[%s207_s0 + $0xb] sm:$0x1]  }
   0x3   :  { %v106_v5 = vld [vmem:[%s207_s0 + $0xa] sm:$0x1]   ;;  %v2_v6 = vld [vmem:[%s207_s0] sm:$0x1]   ;;  %s135_s24 = smov 88   ;;  %s136_s25 = smov 80  }
   0x4   :  { %4 = vst.msk [vmem:[#allocation0] sm:$0x1] %vm3_vm0, %v2_v6   ;;  %v107_v7 = vld [vmem:[%s207_s0 + $0x9] sm:$0x1]   ;;  %v108_v8 = vld [vmem:[%s207_s0 + $0x8] sm:$0x1]  }
   0x5   :  { %s137_s30 = smov 72   ;;  %s138_s2 = smov 64   ;;  %v109_v9 = vld [vmem:[%s207_s0 + $0x7] sm:$0x1]   ;;  %v110_v10 = vld [vmem:[%s207_s0 + $0x6] sm:$0x1]  }
   0x6   :  { %13 = vrot.lane.b32.xlu0 %v102_v2, %s133_s16  ;;  %25 = vrot.lane.b32.xlu1 %v104_v3, %s134_s17  ;;  %s139_s7 = smov 56   ;;  %s140_s8 = smov 48   ;;  %v111_v11 = vld [vmem:[%s207_s0 + $0x5] sm:$0x1]   ;;  %v112_v12 = vld [vmem:[%s207_s0 + $0x4] sm:$0x1]  }
   0x7   :  { %s141_s13 = smov 40   ;;  %s142_s14 = smov 32   ;;  %v113_v13 = vld [vmem:[%s207_s0 + $0x3] sm:$0x1]   ;;  %v114_v14 = vld [vmem:[%s207_s0 + $0x2] sm:$0x1]  }
   0x8   :  { %s143_s19 = smov 24   ;;  %s144_s20 = smov 16   ;;  %v115_v15 = vld [vmem:[%s207_s0 + $0x1] sm:$0x1]   ;;  %vm27_vm4 = vcmask 851712   ;;  %vm33_vm5 = vcmask 786112  }
   0x9   :  { %s145_s0 = smov 8   ;;  %vm39_vm6 = vcmask 720512   ;;  %vm45_vm7 = vcmask 654912   ;;  %vm51_vm8 = vcmask 589312   ;;  %vm57_vm9 = vcmask 523712  }
   0xa   :  { %31 = vrot.lane.b32.xlu0 %v105_v4, %s135_s24  ;;  %37 = vrot.lane.b32.xlu1 %v106_v5, %s136_s25  ;;  %vm63_vm10 = vcmask 458112   ;;  %vm69_vm11 = vcmask 392512   ;;  %vm75_vm12 = vcmask 326912   ;;  %vm81_vm13 = vcmask 261312  }
   0xb   :  { %vm87_vm14 = vcmask 195712   ;;  %vm93_vm15 = vcmask 130112  }
   0xe   :  { %43 = vrot.lane.b32.xlu0 %v107_v7, %s137_s30  ;;  %49 = vrot.lane.b32.xlu1 %v108_v8, %s138_s2 }
  0x12   :  { %55 = vrot.lane.b32.xlu0 %v109_v9, %s139_s7  ;;  %61 = vrot.lane.b32.xlu1 %v110_v10, %s140_s8 }
  0x16   :  { %67 = vrot.lane.b32.xlu0 %v111_v11, %s141_s13  ;;  %73 = vrot.lane.b32.xlu1 %v112_v12, %s142_s14 }
  0x1a   :  { %79 = vrot.lane.b32.xlu0 %v113_v13, %s143_s19  ;;  %85 = vrot.lane.b32.xlu1 %v114_v14, %s144_s20 }
  0x1e   :  { %91 = vrot.lane.b32.xlu0 %v115_v15, %s145_s0 }
  0x74   :  { %v8_v16 = vpop.permute.xlu0 %7   ;;  %v20_v17 = vpop.permute.xlu1 %19  }
  0x75   :  { %10 = vst.msk [vmem:[#allocation0] sm:$0x1] %vm9_vm1, %v8_v16  }
  0x78   :  { %v14_v18 = vpop.permute.xlu0 %13   ;;  %v26_v19 = vpop.permute.xlu1 %25  }
  0x79   :  { %16 = vst.msk [vmem:[#allocation0] sm:$0x1] %vm15_vm2, %v14_v18  }
  0x7a   :  { %22 = vst.msk [vmem:[#allocation0] sm:$0x1] %vm21_vm3, %v20_v17  }
  0x7b   :  { %28 = vst.msk [vmem:[#allocation0] sm:$0x1] %vm27_vm4, %v26_v19  }
  0x7c   :  { %v32_v20 = vpop.permute.xlu0 %31   ;;  %v38_v21 = vpop.permute.xlu1 %37  }
  0x7d   :  { %34 = vst.msk [vmem:[#allocation0] sm:$0x1] %vm33_vm5, %v32_v20  }
  0x7e   :  { %40 = vst.msk [vmem:[#allocation0] sm:$0x1] %vm39_vm6, %v38_v21  }
  0x80   :  { %v44_v22 = vpop.permute.xlu0 %43   ;;  %v50_v23 = vpop.permute.xlu1 %49  }
  0x81   :  { %46 = vst.msk [vmem:[#allocation0] sm:$0x1] %vm45_vm7, %v44_v22  }
  0x82   :  { %52 = vst.msk [vmem:[#allocation0] sm:$0x1] %vm51_vm8, %v50_v23  }
  0x84   :  { %v56_v24 = vpop.permute.xlu0 %55   ;;  %v62_v25 = vpop.permute.xlu1 %61  }
  0x85   :  { %58 = vst.msk [vmem:[#allocation0] sm:$0x1] %vm57_vm9, %v56_v24  }
  0x86   :  { %64 = vst.msk [vmem:[#allocation0] sm:$0x1] %vm63_vm10, %v62_v25  }
  0x88   :  { %v68_v26 = vpop.permute.xlu0 %67   ;;  %v74_v27 = vpop.permute.xlu1 %73  }
  0x89   :  { %70 = vst.msk [vmem:[#allocation0] sm:$0x1] %vm69_vm11, %v68_v26  }
  0x8a   :  { %76 = vst.msk [vmem:[#allocation0] sm:$0x1] %vm75_vm12, %v74_v27  }
  0x8c   :  { %v80_v28 = vpop.permute.xlu0 %79   ;;  %v86_v29 = vpop.permute.xlu1 %85  }
  0x8d   :  { %82 = vst.msk [vmem:[#allocation0] sm:$0x1] %vm81_vm13, %v80_v28  }
  0x8e   :  { %88 = vst.msk [vmem:[#allocation0] sm:$0x1] %vm87_vm14, %v86_v29  }
  0x90   :  { %v92_v30 = vpop.permute.xlu0 %91  }
  0x91   :  { %94 = vst.msk [vmem:[#allocation0] sm:$0x1] %vm93_vm15, %v92_v30  }
  0x98   :  { %v98_v31 = vld [vmem:[#allocation0] sm:$0x1] }
  0x99   :  { %100 = vst [vmem:[%s208_s1] sm:$0x1] %v98_v31 }

// kernel: double_conv_pallas.1
= control target key start
LH: loop header
LB: loop body
LE: loop exit
PB: predicated region body
PF: predicated region fallthrough
CT: control target
= control target key end

     0   :  { %s2192_s28 = smov 4   ;;  %s2193_s29 = smov 124   ;;  %vm57_vm0 = vcmask 1040384   ;;  %vm58_vm1 = vsmask.f32 256  ;;  %vm105_vm3 = vcmask 1047552   ;;  %s2775_s0 = inlined_call_operand.vmem [shape: bf16[2,16,64], index: 0, kind: input, shape index: {}]   ;;  %s2776_s1 = inlined_call_operand.vmem [shape: bf16[576,128], index: 1, kind: input, shape index: {}]   ;;  %s2777_s4 = inlined_call_operand.vmem [shape: bf16[1152,128], index: 4, kind: input, shape index: {}]   ;;  %s2778_s2 = inlined_call_operand.vmem [shape: f32[1,128], index: 2, kind: input, shape index: {}]   ;;  %s2779_s3 = inlined_call_operand.vmem [shape: f32[1,128], index: 3, kind: input, shape index: {}]   ;;  %s2780_s5 = inlined_call_operand.vmem [shape: f32[1,128], index: 5, kind: input, shape index: {}]   ;;  %s2781_s6 = inlined_call_operand.vmem [shape: f32[1,128], index: 6, kind: input, shape index: {}]   ;;  %s2782_s7 = inlined_call_operand.vmem [shape: f32[2,16,128], index: 7, kind: output, shape index: {}]  }
   0x1   :  { %v2242_v0 = vld [vmem:[%s2775_s0] sm:$0xff]   ;;  %v2247_v1 = vld [vmem:[%s2775_s0 + $0x8] sm:$0xff]   ;;  %vm2257_vm2 = vmand %vm57_vm0, %vm58_vm1  ;;  %vm106_vm4 = vsmask.f32 7424  ;;  %s2194_s12 = smov 64   ;;  %vm68_vm6 = vcmask 31744  }
   0x2   :  { %83 = vrot.lane.b32.xlu0 %v2242_v0, %s2192_s28  ;;  %91 = vrot.lane.b32.xlu1 %v2242_v0, %s2193_s29  ;;  %v42_v2 = vshrl.u32 %v2242_v0, 16  ;;  %v45_v3 = vshll.u32 %v2242_v0, 16  ;;  %v49_v4 = vshrl.u32 %v2247_v1, 16  ;;  %v52_v5 = vshll.u32 %v2247_v1, 16  ;;  %vm2271_vm5 = vmand %vm105_vm3, %vm106_vm4  ;;  %v2080_v18 = vld [vmem:[%s2776_s1 + $0x40] sm:$0xff]   ;;  %v2082_v20 = vld [vmem:[%s2776_s1 + $0x48] sm:$0xff]  }
   0x3   :  { %v2081_v19 = vld [vmem:[%s2776_s1] sm:$0xff]   ;;  %1855 = vmatprep.subr.bf16.mxu0 %v2080_v18  ;;  %v2083_v22 = vld [vmem:[%s2776_s1 + $0x8] sm:$0xff]   ;;  %v2084_v23 = vld [vmem:[%s2776_s1 + $0x50] sm:$0xff]   ;;  %vm78_vm7 = vcmask 490496   ;;  %vm148_vm8 = vcmask 523264   ;;  %s2196_s14 = smov 16  }
   0x4   :  { %v44_v6 = vrot.slane %v42_v2, 7  ;;  %v51_v8 = vrot.slane %v49_v4, 7  ;;  %v101_v9 = vrot.slane %v52_v5, 1  ;;  %v99_v11 = vrot.slane %v45_v3, 1  ;;  %1856 = vmatpush3.bf16.msra.mxu0 %v2081_v19  ;;  %v2085_v24 = vld [vmem:[%s2776_s1 + $0x10] sm:$0xff]   ;;  %v2086_v25 = vld [vmem:[%s2776_s1 + $0xc0] sm:$0xff]  }
   0x5   :  { %1857 = vmatprep.subr.bf16.mxu0 %v2082_v20  ;;  %v2087_v26 = vld [vmem:[%s2776_s1 + $0x58] sm:$0xff]   ;;  %1883 = vmatprep.subr.bf16.mxu1 %v2086_v25  ;;  %v2088_v27 = vld [vmem:[%s2776_s1 + $0x80] sm:$0xff]   ;;  %v2090_v29 = vld [vmem:[%s2776_s1 + $0xc8] sm:$0xff]   ;;  %s2197_s15 = smov 32   ;;  %vm730_vm9 = vcmask 64512   ;;  %vm741_vm11 = vcmask 982016  }
   0x6   :  { %85 = vrot.lane.b32.xlu0 %v2247_v1, %s2192_s28  ;;  %93 = vrot.lane.b32.xlu1 %v2247_v1, %s2193_s29  ;;  %v47_v10 = vor.u32 %v45_v3, %v44_v6  ;;  %v54_v12 = vor.u32 %v52_v5, %v51_v8  ;;  %v2265_v13 = vor.u32 %v101_v9, %v49_v4  ;;  %v2089_v28 = vld [vmem:[%s2776_s1 + $0x18] sm:$0xff]   ;;  %v2091_v30 = vld [vmem:[%s2776_s1 + $0x60] sm:$0xff]   ;;  %vm2608_vm10 = vmneg %vm730_vm9 }
   0x7   :  { %v100_v16 = vor.u32 %v99_v11, %v42_v2  ;;  %1884 = vmatpush3.bf16.msra.mxu1 %v2088_v27  ;;  %v2092_v31 = vld [vmem:[%s2776_s1 + $0x88] sm:$0xff]   ;;  %v2093_v32 = vld [vmem:[%s2776_s1 + $0x20] sm:$0xff]   ;;  %v2094_v33 = vld [vmem:[%s2776_s1 + $0xd0] sm:$0xff]  }
   0x8   :  { %v60_v14 = vsel %vm2257_vm2, 0, %v47_v10  ;;  %v2277_v17 = vsel %vm2257_vm2, 0, %v54_v12  ;;  %1858 = vmatpush3.bf16.msra.mxu0 %v2083_v22  ;;  %1885 = vmatprep.subr.bf16.mxu1 %v2090_v29  ;;  %v2095_v34 = vld [vmem:[%s2776_s1 + $0x68] sm:$0xff]   ;;  %v2096_v35 = vld [vmem:[%s2776_s1 + $0x90] sm:$0xff]   ;;  %v2098_v37 = vld [vmem:[%s2776_s1 + $0xd8] sm:$0xff]   ;;  %v109_v56 = vsel %vm2271_vm5, %v2265_v13, 0 }
   0x9   :  { %v2293_v21 = vsel %vm2271_vm5, %v100_v16, 0  ;;  %1859 = vmatprep.subr.bf16.mxu0 %v2084_v23  ;;  %v2097_v36 = vld [vmem:[%s2776_s1 + $0x28] sm:$0xff]   ;;  %v2099_v38 = vld [vmem:[%s2776_s1 + $0x70] sm:$0xff]   ;;  %v2100_v39 = vld [vmem:[%s2776_s1 + $0x98] sm:$0xff]  }
   0xa   :  { %64 = vrot.lane.b32.xlu1 %v60_v14, %s2192_s28  ;;  %74 = vrot.lane.b32.xlu0 %v60_v14, %s2193_s29  ;;  %v2101_v40 = vld [vmem:[%s2776_s1 + $0x30] sm:$0xff]   ;;  %v2102_v41 = vld [vmem:[%s2776_s1 + $0xe0] sm:$0xff]  }
   0xb   :  { %1886 = vmatpush3.bf16.msra.mxu1 %v2092_v31  ;;  %v2103_v42 = vld [vmem:[%s2776_s1 + $0x78] sm:$0xff]   ;;  %v2104_v43 = vld [vmem:[%s2776_s1 + $0xa0] sm:$0xff]   ;;  %v2106_v45 = vld [vmem:[%s2776_s1 + $0xe8] sm:$0xff]  }
   0xc   :  { %1860 = vmatpush3.bf16.msra.mxu0 %v2085_v24  ;;  %1887 = vmatprep.subr.bf16.mxu1 %v2094_v33  ;;  %v2105_v44 = vld [vmem:[%s2776_s1 + $0x38] sm:$0xff]   ;;  %v2107_v46 = vld [vmem:[%s2776_s1 + $0xa8] sm:$0xff]   ;;  %v2108_v47 = vld [vmem:[%s2776_s1 + $0x100] sm:$0xff]  }
   0xd   :  { %1861 = vmatprep.subr.bf16.mxu0 %v2087_v26  ;;  %v2109_v48 = vld [vmem:[%s2776_s1 + $0xf0] sm:$0xff]   ;;  %v2112_v50 = vld [vmem:[%s2776_s1 + $0xf8] sm:$0xff]   ;;  %v2111_v10 = vld [vmem:[%s2776_s1 + $0x108] sm:$0xff]  }
   0xe   :  { %128 = vrot.lane.b32.xlu1 %v60_v14, %s2194_s12  ;;  %76 = vrot.lane.b32.xlu0 %v2277_v17, %s2193_s29  ;;  %v2110_v49 = vld [vmem:[%s2776_s1 + $0xb0] sm:$0xff]   ;;  %v2113_v51 = vld [vmem:[%s2776_s1 + $0xb8] sm:$0xff]  }
   0xf   :  { %1888 = vmatpush3.bf16.msra.mxu1 %v2096_v35  ;;  %v2115_v23 = vld [vmem:[%s2776_s1 + $0x118] sm:$0xff]   ;;  %v2150_v15 = vld [vmem:[%s2777_s4 + $0x100] sm:$0xff]  }
  0x10   :  { %1862 = vmatpush3.bf16.msra.mxu0 %v2089_v28  ;;  %1889 = vmatprep.subr.bf16.mxu1 %v2098_v37 }
  0x11   :  { %1863 = vmatprep.subr.bf16.mxu0 %v2091_v30 }
  0x12   :  { %112 = vrot.lane.b32.xlu1 %v2293_v21, %s2192_s28 }
  0x13   :  { %1890 = vmatpush3.bf16.msra.mxu1 %v2100_v39 }
  0x14   :  { %1864 = vmatpush3.bf16.msra.mxu0 %v2093_v32  ;;  %1891 = vmatprep.subr.bf16.mxu1 %v2102_v41 }
  0x15   :  { %1865 = vmatprep.subr.bf16.mxu0 %v2095_v34 }
  0x16   :  { %130 = vrot.lane.b32.xlu1 %v2277_v17, %s2194_s12 }
  0x17   :  { %1892 = vmatpush3.bf16.msra.mxu1 %v2104_v43 }
  0x18   :  { %1866 = vmatpush3.bf16.msra.mxu0 %v2097_v36  ;;  %1893 = vmatprep.subr.bf16.mxu1 %v2106_v45 }
  0x19   :  { %1867 = vmatprep.subr.bf16.mxu0 %v2099_v38 }
  0x1b   :  { %1894 = vmatpush3.bf16.msra.mxu1 %v2107_v46 }
  0x1c   :  { %1868 = vmatpush3.bf16.msra.mxu0 %v2101_v40  ;;  %1895 = vmatprep.subr.bf16.mxu1 %v2109_v48 }
  0x1d   :  { %1869 = vmatprep.subr.bf16.mxu0 %v2103_v42 }
  0x1f   :  { %1896 = vmatpush3.bf16.msra.mxu1 %v2110_v49 }
  0x20   :  { %1870 = vmatpush3.bf16.msra.mxu0 %v2105_v44  ;;  %1897 = vmatprep.subr.bf16.mxu1 %v2112_v50 }
  0x21   :  { %2039 = vmatprep.subr.bf16.mxu0 %v2108_v47 }
  0x23   :  { %1898 = vmatpush3.bf16.msra.mxu1 %v2113_v51 }
  0x74   :  { %v84_v52 = vpop.permute.xlu0 %83  ;;  %v92_v57 = vpop.permute.xlu1 %91 }
  0x75   :  { %v88_v53 = vsel %vm68_vm6, 0, %v84_v52  ;;  %v96_v58 = vsel %vm78_vm7, %v92_v57, 0 }
  0x76   :  { %134 = vrot.lane.b32.xlu0 %v88_v53, %s2194_s12 }
  0x78   :  { %v86_v54 = vpop.permute.xlu0 %85  ;;  %v94_v59 = vpop.permute.xlu1 %93 }
  0x79   :  { %v90_v55 = vsel %vm68_vm6, 0, %v86_v54  ;;  %v98_v60 = vsel %vm78_vm7, %v94_v59, 0 }
  0x7a   :  { %136 = vrot.lane.b32.xlu1 %v90_v55, %s2194_s12  ;;  %66 = vrot.lane.b32.xlu0 %v2277_v17, %s2192_s28  ;;  %v2114_v17 = vld [vmem:[%s2776_s1 + $0x110] sm:$0xff]   ;;  %s2195_s1 = smov 8  }
  0x7c   :  { %v65_v61 = vpop.permute.xlu1 %64  ;;  %v75_v63 = vpop.permute.xlu0 %74 }
  0x7d   :  { %v71_v5 = vsel %vm68_vm6, 0, %v65_v61  ;;  %v80_v6 = vsel %vm78_vm7, %v75_v63, 0 }
  0x7e   :  { %144 = vrot.lane.b32.xlu0 %v2293_v21, %s2194_s12  ;;  %114 = vrot.lane.b32.xlu1 %v109_v56, %s2192_s28 }
  0x80   :  { %v129_v62 = vpop.permute.xlu1 %128  ;;  %v77_v3 = vpop.permute.xlu0 %76 }
  0x81   :  { %v150_v11 = vsel %vm148_vm8, %v71_v5, %v129_v62  ;;  %v82_v12 = vsel %vm78_vm7, %v77_v3, 0 }
  0x82   :  { %140 = vrot.lane.b32.xlu0 %v96_v58, %s2194_s12  ;;  %146 = vrot.lane.b32.xlu1 %v109_v56, %s2194_s12 }
  0x84   :  { %v113_v2 = vpop.permute.xlu1 %112 }
  0x85   :  { %v117_v19 = vsel %vm68_vm6, 0, %v113_v2 }
  0x86   :  { %120 = vrot.lane.b32.xlu0 %v2293_v21, %s2193_s29  ;;  %142 = vrot.lane.b32.xlu1 %v98_v60, %s2194_s12 }
  0x88   :  { %v131_v4 = vpop.permute.xlu1 %130 }
  0x8a   :  { %122 = vrot.lane.b32.xlu0 %v109_v56, %s2193_s29 }
  0xe8   :  { %v135_v8 = vpop.permute.xlu0 %134 }
  0xe9   :  { %v156_v9 = vsel %vm148_vm8, %v80_v6, %v135_v8 }
  0xea   :  { %497 = vmatprep.mubr.bf16.mxu0 %v156_v9 }
  0xeb   :  { %498 = vmatmul.mubr.bf16.vlgmr.msra.gmra.mrb[0].mxu0 %v150_v11 }
  0xec   :  { %v137_v13 = vpop.permute.xlu1 %136  ;;  %v67_v14 = vpop.permute.xlu0 %66  ;;  %2040 = vmatpush3.bf16.msra.mxu0 %v2108_v47 }
  0xed   :  { %v159_v16 = vsel %vm148_vm8, %v82_v12, %v137_v13  ;;  %2041 = vmatprep.subr.bf16.mxu0 %v2111_v10  ;;  %v73_v18 = vsel %vm68_vm6, 0, %v67_v14 }
  0xee   :  { %505 = vmatprep.mubr.bf16.mxu0 %v159_v16  ;;  %v153_v25 = vsel %vm148_vm8, %v73_v18, %v131_v4 }
  0xf0   :  { %v145_v20 = vpop.permute.xlu0 %144  ;;  %v115_v21 = vpop.permute.xlu1 %114  ;;  %2042 = vmatpush3.bf16.msra.mxu0 %v2111_v10 }
  0xf1   :  { %v168_v22 = vsel %vm148_vm8, %v117_v19, %v145_v20  ;;  %2043 = vmatprep.subr.bf16.mxu0 %v2114_v17  ;;  %v119_v24 = vsel %vm68_vm6, 0, %v115_v21 }
  0xf2   :  { %546 = vmatprep.mubr.bf16.mxu1 %v168_v22 }
  0xf3   :  { %506 = vmatmul.mubr.bf16.gmra.mrb[4].mxu0 %v153_v25  ;;  %v636_v25 = vlaneseq }
  0xf4   :  { %v141_v26 = vpop.permute.xlu0 %140  ;;  %v147_v27 = vpop.permute.xlu1 %146  ;;  %2044 = vmatpush3.bf16.msra.mxu0 %v2114_v17 }
  0xf5   :  { %v162_v28 = vsel %vm148_vm8, %v2242_v0, %v141_v26  ;;  %v171_v29 = vsel %vm148_vm8, %v119_v24, %v147_v27  ;;  %2045 = vmatprep.subr.bf16.mxu0 %v2115_v23  ;;  %v637_v26 = vshrl.u32 %v636_v25, 7 }
  0xf6   :  { %547 = vmatmul.mubr.bf16.vlgmr.msra.gmra.mrb[0].mxu1 %v162_v28 }
  0xf7   :  { %554 = vmatprep.mubr.bf16.mxu1 %v171_v29  ;;  %v2442_v28 = vsub.s32 0, %v637_v26  ;;  %v2144_v26 = vld [vmem:[%s2777_s4 + $0x78] sm:$0xff]  }
  0xf8   :  { %v121_v30 = vpop.permute.xlu0 %120  ;;  %2046 = vmatpush3.bf16.msra.mxu0 %v2115_v23  ;;  %v143_v31 = vpop.permute.xlu1 %142 }
  0xf9   :  { %v125_v32 = vsel %vm78_vm7, %v121_v30, 0  ;;  %v165_v33 = vsel %vm148_vm8, %v2247_v1, %v143_v31 }
  0xfa   :  { %2047 = vmatprep.mubr.msk.bf16.mxu0 %vm148_vm8, %v125_v32 }
  0xfc   :  { %v123_v34 = vpop.permute.xlu0 %122 }
  0xfd   :  { %v127_v35 = vsel %vm78_vm7, %v123_v34, 0 }
  0xfe   :  { %555 = vmatmul.mubr.bf16.gmra.mrb[4].mxu1 %v165_v33  ;;  %2048 = vmatmul.mubr.msk.bf16.vlgmr.msra.gmra.mrb[8].mxu0 %vm148_vm8, %v127_v35 }
 0x1be   :  { %v1871_v0 = vpop.f32.mrb[0].mxu0 }
 0x1bf   :  { %v1872_v36 = vpop.f32.mrb[1].mxu0 }
 0x1c0   :  { %v1873_v37 = vadd.f32 %v1872_v36, %v1871_v0  ;;  %v1874_v38 = vpop.f32.mrb[2].mxu0 }
 0x1c1   :  { %v1875_v39 = vpop.f32.mrb[3].mxu0 }
 0x1c2   :  { %v1876_v40 = vadd.f32 %v1875_v39, %v1874_v38 }
 0x1c6   :  { %v1877_v41 = vpop.f32.mrb[4].mxu0 }
 0x1c7   :  { %v1878_v42 = vpop.f32.mrb[5].mxu0 }
 0x1c8   :  { %v1879_v43 = vadd.f32 %v1878_v42, %v1877_v41  ;;  %v1880_v44 = vpop.f32.mrb[6].mxu0 }
 0x1c9   :  { %v1881_v45 = vpop.f32.mrb[7].mxu0  ;;  %v1899_v46 = vpop.f32.mrb[0].mxu1 }
 0x1ca   :  { %v1882_v47 = vadd.f32 %v1881_v45, %v1880_v44  ;;  %v1900_v1 = vpop.f32.mrb[1].mxu1 }
 0x1cb   :  { %v1901_v48 = vadd.f32 %v1900_v1, %v1899_v46  ;;  %v1902_v49 = vpop.f32.mrb[2].mxu1 }
 0x1cc   :  { %v1903_v50 = vpop.f32.mrb[3].mxu1 }
 0x1cd   :  { %v1904_v51 = vadd.f32 %v1903_v50, %v1902_v49  ;;  %v549_v52 = vadd.f32 %v1901_v48, %v1873_v37 }
 0x1cf   :  { %v552_v53 = vadd.f32 %v1904_v51, %v1876_v40 }
 0x1d1   :  { %v1905_v54 = vpop.f32.mrb[4].mxu1  ;;  %v2049_v55 = vpop.f32.mrb[8].mxu0 }
 0x1d2   :  { %v1906_v56 = vpop.f32.mrb[5].mxu1  ;;  %v597_v57 = vpop.f32.mrb[9].mxu0 }
 0x1d3   :  { %v1907_v58 = vadd.f32 %v1906_v56, %v1905_v54  ;;  %v598_v59 = vadd.f32 %v597_v57, %v549_v52  ;;  %v1908_v60 = vpop.f32.mrb[6].mxu1  ;;  %v2050_v61 = vpop.f32.mrb[10].mxu0  ;;  %v2117_v54 = vld [vmem:[%s2777_s4 + $0xc0] sm:$0xff]   ;;  %v2120_v57 = vld [vmem:[%s2777_s4 + $0x48] sm:$0xff]  }
 0x1d4   :  { %v1909_v62 = vpop.f32.mrb[7].mxu1  ;;  %v600_v63 = vpop.f32.mrb[11].mxu0  ;;  %1945 = vmatprep.subr.bf16.mxu0 %v2117_v54  ;;  %v2119_v56 = vld [vmem:[%s2777_s4 + $0x80] sm:$0xff]  }
 0x1d5   :  { %v557_v2 = vadd.f32 %v1907_v58, %v1879_v43  ;;  %v1910_v3 = vadd.f32 %v1909_v62, %v1908_v60  ;;  %v601_v4 = vadd.f32 %v600_v63, %v552_v53  ;;  %v2116_v53 = vld [vmem:[%s2777_s4 + $0x40] sm:$0xff]   ;;  %1946 = vmatpush3.bf16.msra.mxu0 %v2119_v56  ;;  %v2121_v58 = vld [vmem:[%s2777_s4 + $0xc8] sm:$0xff]   ;;  %v2125_v62 = vld [vmem:[%s2777_s4 + $0xd0] sm:$0xff]  }
 0x1d6   :  { %1917 = vmatprep.subr.bf16.mxu1 %v2116_v53  ;;  %1947 = vmatprep.subr.bf16.mxu0 %v2121_v58  ;;  %v2123_v60 = vld [vmem:[%s2777_s4 + $0x88] sm:$0xff]   ;;  %v2126_v63 = vld [vmem:[%s2777_s4 + $0x10] sm:$0xff]  }
 0x1d7   :  { %v606_v5 = vadd.f32 %v2049_v55, %v557_v2  ;;  %v560_v6 = vadd.f32 %v1910_v3, %v1882_v47  ;;  %v614_v8 = vadd.f32 %v601_v4, %v598_v59  ;;  %v2118_v55 = vld [vmem:[%s2777_s4] sm:$0xff]   ;;  %v2127_v2 = vld [vmem:[%s2777_s4 + $0x90] sm:$0xff]   ;;  %v2128_v3 = vld [vmem:[%s2777_s4 + $0x58] sm:$0xff]  }
 0x1d8   :  { %1918 = vmatpush3.bf16.msra.mxu1 %v2118_v55 }
 0x1d9   :  { %v609_v9 = vadd.f32 %v2050_v61, %v560_v6  ;;  %v615_v10 = vadd.f32 %v614_v8, %v606_v5  ;;  %1919 = vmatprep.subr.bf16.mxu1 %v2120_v57  ;;  %v2124_v61 = vld [vmem:[%s2777_s4 + $0x50] sm:$0xff]   ;;  %1948 = vmatpush3.bf16.msra.mxu0 %v2123_v60  ;;  %v2131_v6 = vld [vmem:[%s2777_s4 + $0x98] sm:$0xff]   ;;  %v2132_v8 = vld [vmem:[%s2777_s4 + $0x60] sm:$0xff]  }
 0x1da   :  { %1949 = vmatprep.subr.bf16.mxu0 %v2125_v62 }
 0x1db   :  { %v616_v11 = vadd.f32 %v615_v10, %v609_v9  ;;  %v2134_v10 = vld [vmem:[%s2777_s4 + $0x20] sm:$0xff]  }
 0x1dd   :  { %v617_v12 = vrot.slane %v616_v11, 4  ;;  %1950 = vmatpush3.bf16.msra.mxu0 %v2127_v2 }
 0x1df   :  { %v618_v13 = vadd.f32 %v617_v12, %v616_v11  ;;  %v2135_v11 = vld [vmem:[%s2777_s4 + $0xa0] sm:$0xff]   ;;  %v2136_v12 = vld [vmem:[%s2777_s4 + $0x68] sm:$0xff]  }
 0x1e1   :  { %v619_v14 = vrot.slane %v618_v13, 2 }
 0x1e3   :  { %v620_v16 = vadd.f32 %v619_v14, %v618_v13  ;;  %v2137_v13 = vld [vmem:[%s2777_s4 + $0xe8] sm:$0xff]  }
 0x1e4   :  { %v2138_v14 = vld [vmem:[%s2777_s4 + $0x28] sm:$0xff]  }
 0x1e5   :  { %v621_v17 = vrot.slane %v620_v16, 1 }
 0x1e7   :  { %v622_v18 = vadd.f32 %v621_v17, %v620_v16  ;;  %v2139_v16 = vld [vmem:[%s2777_s4 + $0xa8] sm:$0xff]   ;;  %v2140_v17 = vld [vmem:[%s2777_s4 + $0x70] sm:$0xff]  }
 0x1e9   :  { %623 = vrot.lane.b32.xlu0 %v622_v18, %s2195_s1 }
 0x25b   :  { %v624_v19 = vpop.permute.xlu0 %623 }
 0x25c   :  { %v625_v20 = vadd.f32 %v624_v19, %v622_v18  ;;  %v2141_v18 = vld [vmem:[%s2777_s4 + $0xf0] sm:$0xff]  }
 0x25d   :  { %v2142_v19 = vld [vmem:[%s2777_s4 + $0x30] sm:$0xff]  }
 0x25e   :  { %626 = vrot.lane.b32.xlu1 %v625_v20, %s2196_s14 }
 0x2d0   :  { %v627_v21 = vpop.permute.xlu1 %626 }
 0x2d1   :  { %v628_v22 = vadd.f32 %v627_v21, %v625_v20  ;;  %v2143_v20 = vld [vmem:[%s2777_s4 + $0xb0] sm:$0xff]  }
 0x2d3   :  { %629 = vrot.lane.b32.xlu0 %v628_v22, %s2197_s15 }
 0x345   :  { %v630_v23 = vpop.permute.xlu0 %629 }
 0x346   :  { %v631_v24 = vadd.f32 %v630_v23, %v628_v22 }
 0x348   :  { %632 = vrot.lane.b32.xlu1 %v631_v24, %s2194_s12 }
 0x3ba   :  { %v633_v27 = vpop.permute.xlu1 %632 }
 0x3bb   :  { %v634_v29 = vadd.f32 %v633_v27, %v631_v24  ;;  %v2145_v27 = vld [vmem:[%s2777_s4 + $0xf8] sm:$0xff]  }
 0x3bd   :  { %v635_v30 = vmul.f32 0.001953125, %v634_v29 }
 0x3bf   :  { %v639_v31 = vrot.slane %v635_v30, %v2442_v28  ;;  %v2146_v30 = vld [vmem:[%s2777_s4 + $0x38] sm:$0xff]  }
 0x3c1   :  { %v2445_v32 = vsub.f32 %v598_v59, %v639_v31  ;;  %v2447_v33 = vsub.f32 %v601_v4, %v639_v31  ;;  %v2449_v34 = vsub.f32 %v606_v5, %v639_v31  ;;  %v2451_v35 = vsub.f32 %v609_v9, %v639_v31  ;;  %v2122_v59 = vld [vmem:[%s2777_s4 + $0x8] sm:$0xff]   ;;  %v2129_v4 = vld [vmem:[%s2777_s4 + $0xd8] sm:$0xff]   ;;  %v2133_v9 = vld [vmem:[%s2777_s4 + $0xe0] sm:$0xff]  }
 0x3c2   :  { %1920 = vmatpush3.bf16.msra.mxu1 %v2122_v59  ;;  %v2130_v5 = vld [vmem:[%s2777_s4 + $0x18] sm:$0xff]   ;;  %1951 = vmatprep.subr.bf16.mxu0 %v2129_v4 }
 0x3c3   :  { %v644_v0 = vmul.f32 %v2445_v32, %v2445_v32  ;;  %v645_v36 = vmul.f32 %v2447_v33, %v2447_v33  ;;  %v646_v37 = vmul.f32 %v2449_v34, %v2449_v34  ;;  %v647_v39 = vmul.f32 %v2451_v35, %v2451_v35  ;;  %1921 = vmatprep.subr.bf16.mxu1 %v2124_v61  ;;  %v2147_v31 = vld [vmem:[%s2777_s4 + $0xb8] sm:$0xff]  }
 0x3c4   :  { %1952 = vmatpush3.bf16.msra.mxu0 %v2131_v6 }
 0x3c5   :  { %v648_v38 = vadd.f32 %v645_v36, %v644_v0  ;;  %1953 = vmatprep.subr.bf16.mxu0 %v2133_v9  ;;  %v2148_v0 = vld [vmem:[%s2777_s4 + $0x140] sm:$0xff]   ;;  %v2152_v9 = vld [vmem:[%s2777_s4 + $0x1c8] sm:$0xff]  }
 0x3c6   :  { %1922 = vmatpush3.bf16.msra.mxu1 %v2126_v63  ;;  %v1761_v36 = vld [vmem:[%s2778_s2] ss:$0 sm:$0xff]  ;;  %s2198_s2 = smov 120  }
 0x3c7   :  { %v649_v40 = vadd.f32 %v648_v38, %v646_v37  ;;  %1923 = vmatprep.subr.bf16.mxu1 %v2128_v3  ;;  %v2149_v37 = vld [vmem:[%s2777_s4 + $0x1c0] sm:$0xff]  }
 0x3c8   :  { %1954 = vmatpush3.bf16.msra.mxu0 %v2135_v11 }
 0x3c9   :  { %v650_v41 = vadd.f32 %v649_v40, %v647_v39  ;;  %1955 = vmatprep.subr.bf16.mxu0 %v2137_v13  ;;  %v2154_v13 = vld [vmem:[%s2777_s4 + $0x108] sm:$0xff]  }
 0x3ca   :  { %1924 = vmatpush3.bf16.msra.mxu1 %v2130_v5 }
 0x3cb   :  { %v651_v42 = vrot.slane %v650_v41, 4  ;;  %1925 = vmatprep.subr.bf16.mxu1 %v2132_v8  ;;  %v2151_v8 = vld [vmem:[%s2777_s4 + $0x180] sm:$0xff]  }
 0x3cc   :  { %1956 = vmatpush3.bf16.msra.mxu0 %v2139_v16  ;;  %v2156_v16 = vld [vmem:[%s2777_s4 + $0x1d0] sm:$0xff]  }
 0x3cd   :  { %v652_v43 = vadd.f32 %v651_v42, %v650_v41  ;;  %1957 = vmatprep.subr.bf16.mxu0 %v2141_v18  ;;  %v1762_v42 = vld [vmem:[%s2779_s3] ss:$0 sm:$0xff] }
 0x3ce   :  { %1926 = vmatpush3.bf16.msra.mxu1 %v2134_v10 }
 0x3cf   :  { %v653_v44 = vrot.slane %v652_v43, 2  ;;  %1927 = vmatprep.subr.bf16.mxu1 %v2136_v12  ;;  %v2153_v12 = vld [vmem:[%s2777_s4 + $0x148] sm:$0xff]  }
 0x3d0   :  { %1958 = vmatpush3.bf16.msra.mxu0 %v2143_v20  ;;  %v2158_v20 = vld [vmem:[%s2777_s4 + $0x110] sm:$0xff]  }
 0x3d1   :  { %v654_v45 = vadd.f32 %v653_v44, %v652_v43  ;;  %1959 = vmatprep.subr.bf16.mxu0 %v2145_v27  ;;  %v2164_v27 = vld [vmem:[%s2777_s4 + $0x1e0] sm:$0xff]  }
 0x3d2   :  { %1928 = vmatpush3.bf16.msra.mxu1 %v2138_v14  ;;  %v2155_v14 = vld [vmem:[%s2777_s4 + $0x188] sm:$0xff]  }
 0x3d3   :  { %v655_v46 = vrot.slane %v654_v45, 1  ;;  %1929 = vmatprep.subr.bf16.mxu1 %v2140_v17  ;;  %v2157_v17 = vld [vmem:[%s2777_s4 + $0x150] sm:$0xff]  }
 0x3d4   :  { %1960 = vmatpush3.bf16.msra.mxu0 %v2147_v31  ;;  %v2166_v31 = vld [vmem:[%s2777_s4 + $0x120] sm:$0xff]  }
 0x3d5   :  { %v656_v47 = vadd.f32 %v655_v46, %v654_v45  ;;  %2001 = vmatprep.subr.bf16.mxu0 %v2149_v37  ;;  %v2169_v37 = vld [vmem:[%s2777_s4 + $0x168] sm:$0xff]  }
 0x3d6   :  { %1930 = vmatpush3.bf16.msra.mxu1 %v2142_v19 }
 0x3d7   :  { %657 = vrot.lane.b32.xlu0 %v656_v47, %s2195_s1  ;;  %1931 = vmatprep.subr.bf16.mxu1 %v2144_v26  ;;  %v2163_v26 = vld [vmem:[%s2777_s4 + $0x198] sm:$0xff]  }
 0x3da   :  { %1932 = vmatpush3.bf16.msra.mxu1 %v2146_v30  ;;  %v2165_v30 = vld [vmem:[%s2777_s4 + $0x160] sm:$0xff]  }
 0x3db   :  { %1973 = vmatprep.subr.bf16.mxu1 %v2148_v0  ;;  %v2167_v0 = vld [vmem:[%s2777_s4 + $0x1a0] sm:$0xff]  }
 0x449   :  { %v658_v1 = vpop.permute.xlu0 %657 }
 0x44a   :  { %v659_v48 = vadd.f32 %v658_v1, %v656_v47 }
 0x44c   :  { %660 = vrot.lane.b32.xlu1 %v659_v48, %s2196_s14 }
 0x4be   :  { %v661_v49 = vpop.permute.xlu1 %660 }
 0x4bf   :  { %v662_v50 = vadd.f32 %v661_v49, %v659_v48 }
 0x4c1   :  { %663 = vrot.lane.b32.xlu0 %v662_v50, %s2197_s15 }
 0x533   :  { %v664_v51 = vpop.permute.xlu0 %663 }
 0x534   :  { %v665_v52 = vadd.f32 %v664_v51, %v662_v50 }
 0x536   :  { %666 = vrot.lane.b32.xlu1 %v665_v52, %s2194_s12 }
 0x5a8   :  { %v667_v21 = vpop.permute.xlu1 %666 }
 0x5a9   :  { %v668_v22 = vadd.f32 %v667_v21, %v665_v52  ;;  %v2159_v21 = vld [vmem:[%s2777_s4 + $0x190] sm:$0xff]  }
 0x5ab   :  { %v669_v23 = vmul.f32 0.001953125, %v668_v22  ;;  %v2160_v22 = vld [vmem:[%s2777_s4 + $0x1d8] sm:$0xff]  }
 0x5ad   :  { %v670_v24 = vadd.f32 1e-05, %v669_v23 }
 0x5af   :  { %2188 = vrsqrt.f32 %v670_v24  ;;  %v2161_v24 = vld [vmem:[%s2777_s4 + $0x158] sm:$0xff]  }
 0x5b9   :  { %v2189_v25 = vpop.eup %2188 }
 0x5ba   :  { %v675_v29 = vrot.slane %v2189_v25, %v2442_v28  ;;  %v2162_v25 = vld [vmem:[%s2777_s4 + $0x118] sm:$0xff]  }
 0x5bc   :  { %v676_v38 = vmul.f32 %v675_v29, %v2445_v32  ;;  %v677_v39 = vmul.f32 %v675_v29, %v2447_v33  ;;  %v678_v40 = vmul.f32 %v675_v29, %v2449_v34  ;;  %v679_v41 = vmul.f32 %v675_v29, %v2451_v35 }
 0x5be   :  { %v686_v43 = vmul.f32 %v1761_v36, %v676_v38  ;;  %v687_v44 = vmul.f32 %v1761_v36, %v677_v39  ;;  %v688_v45 = vmul.f32 %v1761_v36, %v678_v40  ;;  %v689_v46 = vmul.f32 %v1761_v36, %v679_v41  ;;  %v2168_v36 = vld [vmem:[%s2777_s4 + $0x1e8] sm:$0xff]   ;;  %v2172_v40 = vld [vmem:[%s2777_s4 + $0x170] sm:$0xff]  }
 0x5bf   :  { %v2170_v38 = vld [vmem:[%s2777_s4 + $0x128] sm:$0xff]   ;;  %v2173_v41 = vld [vmem:[%s2777_s4 + $0x1f0] sm:$0xff]  }
 0x5c0   :  { %v696_v47 = vadd.f32 %v1762_v42, %v686_v43  ;;  %v697_v32 = vadd.f32 %v1762_v42, %v687_v44  ;;  %v698_v1 = vadd.f32 %v1762_v42, %v688_v45  ;;  %v699_v33 = vadd.f32 %v1762_v42, %v689_v46  ;;  %v2171_v39 = vld [vmem:[%s2777_s4 + $0x1a8] sm:$0xff]   ;;  %v2174_v42 = vld [vmem:[%s2777_s4 + $0x130] sm:$0xff]   ;;  %v2176_v44 = vld [vmem:[%s2777_s4 + $0x178] sm:$0xff]  }
 0x5c1   :  { %v2175_v43 = vld [vmem:[%s2777_s4 + $0x1b0] sm:$0xff]   ;;  %v2177_v45 = vld [vmem:[%s2777_s4 + $0x1f8] sm:$0xff]  }
 0x5c2   :  { %v700_v48 = vmax.f32 %v696_v47, 0.0  ;;  %v701_v34 = vmax.f32 %v697_v32, 0.0  ;;  %v702_v49 = vmax.f32 %v698_v1, 0.0  ;;  %v703_v35 = vmax.f32 %v699_v33, 0.0  ;;  %v2178_v46 = vld [vmem:[%s2777_s4 + $0x138] sm:$0xff]   ;;  %v2180_v32 = vld [vmem:[%s2777_s4 + $0x200] sm:$0xff]  }
 0x5c3   :  { %v2179_v47 = vld [vmem:[%s2777_s4 + $0x1b8] sm:$0xff]   ;;  %v2181_v33 = vld [vmem:[%s2777_s4 + $0x208] sm:$0xff]  }
 0x5c4   :  { %v2578_v50 = vpack.c.bf16 %v701_v34, %v700_v48  ;;  %v2580_v51 = vpack.c.bf16 %v703_v35, %v702_v49  ;;  %v2182_v34 = vld [vmem:[%s2777_s4 + $0x210] sm:$0xff]   ;;  %v2183_v35 = vld [vmem:[%s2777_s4 + $0x218] sm:$0xff]  }
 0x5c6   :  { %750 = vrot.lane.b32.xlu1 %v2578_v50, %s2195_s1  ;;  %v707_v52 = vshrl.u32 %v2578_v50, 16  ;;  %v714_v53 = vshrl.u32 %v2580_v51, 16  ;;  %v710_v55 = vshll.u32 %v2578_v50, 16  ;;  %v717_v58 = vshll.u32 %v2580_v51, 16 }
 0x5c8   :  { %v709_v54 = vrot.slane %v707_v52, 7  ;;  %v716_v56 = vrot.slane %v714_v53, 7  ;;  %v770_v62 = vrot.slane %v710_v55, 1  ;;  %v772_v2 = vrot.slane %v717_v58, 1 }
 0x5ca   :  { %v712_v57 = vor.u32 %v710_v55, %v709_v54  ;;  %v719_v60 = vor.u32 %v717_v58, %v716_v56  ;;  %v771_v63 = vor.u32 %v770_v62, %v707_v52  ;;  %v773_v4 = vor.u32 %v772_v2, %v714_v53  ;;  %v2184_v52 = vld [vmem:[%s2777_s4 + $0x220] sm:$0xff]   ;;  %v2185_v53 = vld [vmem:[%s2777_s4 + $0x228] sm:$0xff]   ;;  %v2187_v54 = vld [vmem:[%s2777_s4 + $0x238] sm:$0xff]  }
 0x5cc   :  { %v722_v59 = vsel %vm2257_vm2, 0, %v712_v57  ;;  %v723_v61 = vsel %vm2257_vm2, 0, %v719_v60  ;;  %v776_v3 = vsel %vm2271_vm5, %v771_v63, 0  ;;  %v2602_v7 = vsel %vm2271_vm5, %v773_v4, 0 }
 0x5cd   :  { %737 = vrot.lane.b32.xlu1 %v722_v59, %s2198_s2  ;;  %726 = vrot.lane.b32.xlu0 %v722_v59, %s2195_s1 }
 0x5ce   :  { %1408 = vmatprep.mubr.bf16.mxu1 %v722_v59 }
 0x5d1   :  { %752 = vrot.lane.b32.xlu1 %v2580_v51, %s2195_s1  ;;  %728 = vrot.lane.b32.xlu0 %v723_v61, %s2195_s1 }
 0x5d5   :  { %762 = vrot.lane.b32.xlu1 %v2580_v51, %s2198_s2  ;;  %760 = vrot.lane.b32.xlu0 %v2578_v50, %s2198_s2 }
 0x5d9   :  { %790 = vrot.lane.b32.xlu1 %v776_v3, %s2198_s2  ;;  %739 = vrot.lane.b32.xlu0 %v723_v61, %s2198_s2 }
 0x5dd   :  { %792 = vrot.lane.b32.xlu1 %v2602_v7, %s2198_s2  ;;  %780 = vrot.lane.b32.xlu0 %v776_v3, %s2195_s1 }
 0x5e1   :  { %782 = vrot.lane.b32.xlu0 %v2602_v7, %s2195_s1 }
 0x638   :  { %v751_v6 = vpop.permute.xlu1 %750 }
 0x639   :  { %1840 = vmatprep.mubr.msk.bf16.mxu0 %vm2608_vm10, %v751_v6 }
 0x63f   :  { %v738_v10 = vpop.permute.xlu1 %737  ;;  %v727_v11 = vpop.permute.xlu0 %726 }
 0x640   :  { %1836 = vmatmul.mubr.msk.bf16.vlgmr.msra.gmra.mrb[8].mxu1 %vm2608_vm10, %v727_v11  ;;  %1841 = vmatmul.mubr.msk.bf16.vlgmr.msra.gmra.mrb[12].mxu0 %vm741_vm11, %v738_v10 }
 0x641   :  { %1974 = vmatpush3.bf16.msra.mxu1 %v2150_v15  ;;  %2002 = vmatpush3.bf16.msra.mxu0 %v2151_v8 }
 0x642   :  { %1416 = vmatprep.mubr.bf16.mxu1 %v723_v61  ;;  %2003 = vmatprep.subr.bf16.mxu0 %v2152_v9 }
 0x643   :  { %v753_v18 = vpop.permute.xlu1 %752  ;;  %v729_v19 = vpop.permute.xlu0 %728  ;;  %1975 = vmatprep.subr.bf16.mxu1 %v2153_v12 }
 0x644   :  { %1843 = vmatprep.mubr.msk.bf16.mxu0 %vm2608_vm10, %v753_v18 }
 0x645   :  { %1976 = vmatpush3.bf16.msra.mxu1 %v2154_v13  ;;  %2004 = vmatpush3.bf16.msra.mxu0 %v2155_v14 }
 0x646   :  { %2005 = vmatprep.subr.bf16.mxu0 %v2156_v16  ;;  %1977 = vmatprep.subr.bf16.mxu1 %v2157_v17 }
 0x647   :  { %v761_v23 = vpop.permute.xlu0 %760  ;;  %v763_v48 = vpop.permute.xlu1 %762 }
 0x648   :  { %1838 = vmatmul.mubr.msk.bf16.gmra.mrb[12].mxu1 %vm2608_vm10, %v729_v19 }
 0x649   :  { %1978 = vmatpush3.bf16.msra.mxu1 %v2158_v20  ;;  %2006 = vmatpush3.bf16.msra.mxu0 %v2159_v21 }
 0x64a   :  { %1845 = vmatprep.mubr.msk.bf16.mxu1 %vm741_vm11, %v761_v23  ;;  %2007 = vmatprep.subr.bf16.mxu0 %v2160_v22 }
 0x64b   :  { %v740_v29 = vpop.permute.xlu0 %739  ;;  %1979 = vmatprep.subr.bf16.mxu1 %v2161_v24 }
 0x64c   :  { %1844 = vmatmul.mubr.msk.bf16.gmra.mrb[16].mxu0 %vm741_vm11, %v740_v29 }
 0x64d   :  { %1980 = vmatpush3.bf16.msra.mxu1 %v2162_v25  ;;  %2008 = vmatpush3.bf16.msra.mxu0 %v2163_v26 }
 0x64e   :  { %1555 = vmatprep.mubr.bf16.mxu0 %v776_v3  ;;  %2009 = vmatprep.subr.bf16.mxu0 %v2164_v27 }
 0x64f   :  { %1981 = vmatprep.subr.bf16.mxu1 %v2165_v30  ;;  %v781_v1 = vpop.permute.xlu0 %780 }
 0x651   :  { %1982 = vmatpush3.bf16.msra.mxu1 %v2166_v31  ;;  %2010 = vmatpush3.bf16.msra.mxu0 %v2167_v0 }
 0x652   :  { %2011 = vmatprep.subr.bf16.mxu0 %v2168_v36  ;;  %1983 = vmatprep.subr.bf16.mxu1 %v2169_v37 }
 0x653   :  { %v783_v49 = vpop.permute.xlu0 %782 }
 0x655   :  { %1984 = vmatpush3.bf16.msra.mxu1 %v2170_v38  ;;  %2012 = vmatpush3.bf16.msra.mxu0 %v2171_v39 }
 0x656   :  { %1985 = vmatprep.subr.bf16.mxu1 %v2172_v40  ;;  %2013 = vmatprep.subr.bf16.mxu0 %v2173_v41 }
 0x659   :  { %1986 = vmatpush3.bf16.msra.mxu1 %v2174_v42  ;;  %2014 = vmatpush3.bf16.msra.mxu0 %v2175_v43 }
 0x65a   :  { %1987 = vmatprep.subr.bf16.mxu1 %v2176_v44  ;;  %2015 = vmatprep.subr.bf16.mxu0 %v2177_v45 }
 0x65d   :  { %1988 = vmatpush3.bf16.msra.mxu1 %v2178_v46  ;;  %2016 = vmatpush3.bf16.msra.mxu0 %v2179_v47 }
 0x65e   :  { %2051 = vmatprep.subr.bf16.mxu1 %v2180_v32 }
 0x660   :  { %1507 = vmatmul.mubr.bf16.vlgmr.msra.gmra.mrb[16].mxu1 %v2578_v50  ;;  %1848 = vmatmul.mubr.msk.bf16.vlgmr.msra.gmra.mrb[20].mxu0 %vm2608_vm10, %v781_v1  ;;  %v791_v50 = vpop.permute.xlu1 %790 }
 0x661   :  { %1846 = vmatprep.mubr.msk.bf16.mxu1 %vm741_vm11, %v763_v48  ;;  %1563 = vmatprep.mubr.bf16.mxu0 %v2602_v7 }
 0x662   :  { %2052 = vmatpush3.bf16.msra.mxu1 %v2180_v32 }
 0x663   :  { %2053 = vmatprep.subr.bf16.mxu1 %v2181_v33 }
 0x664   :  { %v793_v55 = vpop.permute.xlu1 %792 }
 0x666   :  { %2054 = vmatpush3.bf16.msra.mxu1 %v2181_v33 }
 0x667   :  { %2055 = vmatprep.subr.bf16.mxu1 %v2182_v34 }
 0x668   :  { %1515 = vmatmul.mubr.bf16.gmra.mrb[20].mxu1 %v2580_v51  ;;  %1850 = vmatmul.mubr.msk.bf16.gmra.mrb[24].mxu0 %vm2608_vm10, %v783_v49  ;;  %v2186_v51 = vld [vmem:[%s2777_s4 + $0x230] sm:$0xff]  }
 0x669   :  { %2067 = vmatprep.mubr.msk.bf16.mxu1 %vm741_vm11, %v791_v50 }
 0x66a   :  { %2056 = vmatpush3.bf16.msra.mxu1 %v2182_v34 }
 0x66b   :  { %2057 = vmatprep.subr.bf16.mxu1 %v2183_v35 }
 0x66e   :  { %2058 = vmatpush3.bf16.msra.mxu1 %v2183_v35 }
 0x66f   :  { %2059 = vmatprep.subr.bf16.mxu1 %v2184_v52 }
 0x672   :  { %2060 = vmatpush3.bf16.msra.mxu1 %v2184_v52 }
 0x673   :  { %2061 = vmatprep.subr.bf16.mxu1 %v2185_v53 }
 0x676   :  { %2062 = vmatpush3.bf16.msra.mxu1 %v2185_v53 }
 0x677   :  { %2063 = vmatprep.subr.bf16.mxu1 %v2186_v51 }
 0x67a   :  { %2064 = vmatpush3.bf16.msra.mxu1 %v2186_v51 }
 0x67b   :  { %2065 = vmatprep.subr.bf16.mxu1 %v2187_v54 }
 0x67e   :  { %2066 = vmatpush3.bf16.msra.mxu1 %v2187_v54 }
 0x681   :  { %2068 = vmatmul.mubr.msk.bf16.vlgmr.msra.gmra.mrb[24].mxu1 %vm741_vm11, %v793_v55 }
 0x713   :  { %v1933_v56 = vpop.f32.mrb[8].mxu1  ;;  %v1961_v57 = vpop.f32.mrb[12].mxu0 }
 0x714   :  { %v1934_v58 = vpop.f32.mrb[9].mxu1  ;;  %v1962_v59 = vpop.f32.mrb[13].mxu0 }
 0x715   :  { %v1935_v60 = vadd.f32 %v1934_v58, %v1933_v56  ;;  %v1963_v61 = vadd.f32 %v1962_v59, %v1961_v57  ;;  %v1936_v62 = vpop.f32.mrb[10].mxu1  ;;  %v1964_v63 = vpop.f32.mrb[14].mxu0 }
 0x716   :  { %v1937_v2 = vpop.f32.mrb[11].mxu1  ;;  %v1965_v3 = vpop.f32.mrb[15].mxu0 }
 0x717   :  { %v1460_v4 = vadd.f32 %v1963_v61, %v1935_v60  ;;  %v1938_v7 = vadd.f32 %v1937_v2, %v1936_v62  ;;  %v1966_v5 = vadd.f32 %v1965_v3, %v1964_v63 }
 0x719   :  { %v1463_v6 = vadd.f32 %v1966_v5, %v1938_v7 }
 0x71b   :  { %v1939_v15 = vpop.f32.mrb[12].mxu1 }
 0x71c   :  { %v1940_v8 = vpop.f32.mrb[13].mxu1 }
 0x71d   :  { %v1941_v9 = vadd.f32 %v1940_v8, %v1939_v15  ;;  %v1942_v10 = vpop.f32.mrb[14].mxu1 }
 0x71e   :  { %v1943_v11 = vpop.f32.mrb[15].mxu1 }
 0x71f   :  { %v1944_v12 = vadd.f32 %v1943_v11, %v1942_v10  ;;  %v1967_v13 = vpop.f32.mrb[16].mxu0 }
 0x720   :  { %v1968_v14 = vpop.f32.mrb[17].mxu0 }
 0x721   :  { %v1969_v16 = vadd.f32 %v1968_v14, %v1967_v13  ;;  %v1970_v17 = vpop.f32.mrb[18].mxu0 }
 0x722   :  { %v1971_v18 = vpop.f32.mrb[19].mxu0 }
 0x723   :  { %v1468_v19 = vadd.f32 %v1969_v16, %v1941_v9  ;;  %v1972_v20 = vadd.f32 %v1971_v18, %v1970_v17 }
 0x725   :  { %v1471_v21 = vadd.f32 %v1972_v20, %v1944_v12 }
 0x733   :  { %v1989_v22 = vpop.f32.mrb[16].mxu1  ;;  %v2017_v23 = vpop.f32.mrb[20].mxu0 }
 0x734   :  { %v1990_v24 = vpop.f32.mrb[17].mxu1  ;;  %v2018_v25 = vpop.f32.mrb[21].mxu0 }
 0x735   :  { %v1991_v26 = vadd.f32 %v1990_v24, %v1989_v22  ;;  %v2019_v27 = vadd.f32 %v2018_v25, %v2017_v23  ;;  %v1992_v29 = vpop.f32.mrb[18].mxu1  ;;  %v2020_v30 = vpop.f32.mrb[22].mxu0 }
 0x736   :  { %v1993_v31 = vpop.f32.mrb[19].mxu1  ;;  %v2021_v0 = vpop.f32.mrb[23].mxu0 }
 0x737   :  { %v1509_v36 = vadd.f32 %v1991_v26, %v1460_v4  ;;  %v1994_v37 = vadd.f32 %v1993_v31, %v1992_v29  ;;  %v2022_v38 = vadd.f32 %v2021_v0, %v2020_v30 }
 0x739   :  { %v1512_v39 = vadd.f32 %v1994_v37, %v1463_v6  ;;  %v1558_v40 = vadd.f32 %v2019_v27, %v1509_v36 }
 0x73b   :  { %v1995_v41 = vpop.f32.mrb[20].mxu1  ;;  %v2023_v42 = vpop.f32.mrb[24].mxu0  ;;  %v1561_v43 = vadd.f32 %v2022_v38, %v1512_v39 }
 0x73c   :  { %v1996_v44 = vpop.f32.mrb[21].mxu1  ;;  %v2024_v45 = vpop.f32.mrb[25].mxu0 }
 0x73d   :  { %v1997_v46 = vadd.f32 %v1996_v44, %v1995_v41  ;;  %v2025_v47 = vadd.f32 %v2024_v45, %v2023_v42  ;;  %v1998_v32 = vpop.f32.mrb[22].mxu1  ;;  %v2026_v1 = vpop.f32.mrb[26].mxu0 }
 0x73e   :  { %v1999_v33 = vpop.f32.mrb[23].mxu1  ;;  %v2027_v48 = vpop.f32.mrb[27].mxu0 }
 0x73f   :  { %v1517_v34 = vadd.f32 %v1997_v46, %v1468_v19  ;;  %v2000_v49 = vadd.f32 %v1999_v33, %v1998_v32  ;;  %v2028_v35 = vadd.f32 %v2027_v48, %v2026_v1  ;;  %v1853_v48 = vld [vmem:[%s2780_s5] ss:$0 sm:$0xff] }
 0x741   :  { %v1520_v50 = vadd.f32 %v2000_v49, %v1471_v21  ;;  %v1566_v52 = vadd.f32 %v2025_v47, %v1517_v34 }
 0x743   :  { %v1569_v53 = vadd.f32 %v2028_v35, %v1520_v50 }
 0x754   :  { %v2069_v51 = vpop.f32.mrb[24].mxu1 }
 0x755   :  { %v1615_v54 = vadd.f32 %v2069_v51, %v1566_v52  ;;  %v1606_v55 = vpop.f32.mrb[25].mxu1  ;;  %v1854_v52 = vld [vmem:[%s2781_s6] ss:$0 sm:$0xff] }
 0x756   :  { %v1607_v56 = vadd.f32 %v1606_v55, %v1558_v40  ;;  %v2070_v57 = vpop.f32.mrb[26].mxu1 }
 0x757   :  { %v1618_v58 = vadd.f32 %v2070_v57, %v1569_v53  ;;  %v1609_v59 = vpop.f32.mrb[27].mxu1 }
 0x758   :  { %v1610_v60 = vadd.f32 %v1609_v59, %v1561_v43 }
 0x75a   :  { %v1623_v61 = vadd.f32 %v1610_v60, %v1607_v56 }
 0x75c   :  { %v1624_v62 = vadd.f32 %v1623_v61, %v1615_v54 }
 0x75e   :  { %v1625_v63 = vadd.f32 %v1624_v62, %v1618_v58 }
 0x760   :  { %v1626_v2 = vrot.slane %v1625_v63, 4 }
 0x762   :  { %v1627_v3 = vadd.f32 %v1626_v2, %v1625_v63 }
 0x764   :  { %v1628_v4 = vrot.slane %v1627_v3, 2 }
 0x766   :  { %v1629_v7 = vadd.f32 %v1628_v4, %v1627_v3 }
 0x768   :  { %v1630_v5 = vrot.slane %v1629_v7, 1 }
 0x76a   :  { %v1631_v6 = vadd.f32 %v1630_v5, %v1629_v7 }
 0x76c   :  { %1632 = vrot.lane.b32.xlu0 %v1631_v6, %s2195_s1 }
 0x7de   :  { %v1633_v15 = vpop.permute.xlu0 %1632 }
 0x7df   :  { %v1634_v8 = vadd.f32 %v1633_v15, %v1631_v6 }
 0x7e1   :  { %1635 = vrot.lane.b32.xlu1 %v1634_v8, %s2196_s14 }
 0x853   :  { %v1636_v9 = vpop.permute.xlu1 %1635 }
 0x854   :  { %v1637_v10 = vadd.f32 %v1636_v9, %v1634_v8 }
 0x856   :  { %1638 = vrot.lane.b32.xlu0 %v1637_v10, %s2197_s15 }
 0x8c8   :  { %v1639_v11 = vpop.permute.xlu0 %1638 }
 0x8c9   :  { %v1640_v12 = vadd.f32 %v1639_v11, %v1637_v10 }
 0x8cb   :  { %1641 = vrot.lane.b32.xlu1 %v1640_v12, %s2194_s12 }
 0x93d   :  { %v1642_v13 = vpop.permute.xlu1 %1641 }
 0x93e   :  { %v1643_v14 = vadd.f32 %v1642_v13, %v1640_v12 }
 0x940   :  { %v1644_v16 = vmul.f32 0.001953125, %v1643_v14 }
 0x942   :  { %v1648_v17 = vrot.slane %v1644_v16, %v2442_v28 }
 0x944   :  { %v1649_v18 = vsub.f32 %v1607_v56, %v1648_v17  ;;  %v1650_v19 = vsub.f32 %v1610_v60, %v1648_v17  ;;  %v1651_v20 = vsub.f32 %v1615_v54, %v1648_v17  ;;  %v1652_v21 = vsub.f32 %v1618_v58, %v1648_v17 }
 0x946   :  { %v1653_v22 = vmul.f32 %v1649_v18, %v1649_v18  ;;  %v1654_v23 = vmul.f32 %v1650_v19, %v1650_v19  ;;  %v1655_v24 = vmul.f32 %v1651_v20, %v1651_v20  ;;  %v1656_v26 = vmul.f32 %v1652_v21, %v1652_v21 }
 0x948   :  { %v1657_v25 = vadd.f32 %v1654_v23, %v1653_v22 }
 0x94a   :  { %v1658_v27 = vadd.f32 %v1657_v25, %v1655_v24 }
 0x94c   :  { %v1659_v29 = vadd.f32 %v1658_v27, %v1656_v26 }
 0x94e   :  { %v1660_v30 = vrot.slane %v1659_v29, 4 }
 0x950   :  { %v1661_v31 = vadd.f32 %v1660_v30, %v1659_v29 }
 0x952   :  { %v1662_v0 = vrot.slane %v1661_v31, 2 }
 0x954   :  { %v1663_v36 = vadd.f32 %v1662_v0, %v1661_v31 }
 0x956   :  { %v1664_v37 = vrot.slane %v1663_v36, 1 }
 0x958   :  { %v1665_v38 = vadd.f32 %v1664_v37, %v1663_v36 }
 0x95a   :  { %1666 = vrot.lane.b32.xlu0 %v1665_v38, %s2195_s1 }
 0x9cc   :  { %v1667_v39 = vpop.permute.xlu0 %1666 }
 0x9cd   :  { %v1668_v40 = vadd.f32 %v1667_v39, %v1665_v38 }
 0x9cf   :  { %1669 = vrot.lane.b32.xlu1 %v1668_v40, %s2196_s14 }
 0xa41   :  { %v1670_v41 = vpop.permute.xlu1 %1669 }
 0xa42   :  { %v1671_v42 = vadd.f32 %v1670_v41, %v1668_v40 }
 0xa44   :  { %1672 = vrot.lane.b32.xlu0 %v1671_v42, %s2197_s15 }
 0xab6   :  { %v1673_v43 = vpop.permute.xlu0 %1672 }
 0xab7   :  { %v1674_v44 = vadd.f32 %v1673_v43, %v1671_v42 }
 0xab9   :  { %1675 = vrot.lane.b32.xlu1 %v1674_v44, %s2194_s12 }
 0xb2b   :  { %v1676_v45 = vpop.permute.xlu1 %1675 }
 0xb2c   :  { %v1677_v46 = vadd.f32 %v1676_v45, %v1674_v44 }
 0xb2e   :  { %v1678_v47 = vmul.f32 0.001953125, %v1677_v46 }
 0xb30   :  { %v1679_v32 = vadd.f32 1e-05, %v1678_v47 }
 0xb32   :  { %2190 = vrsqrt.f32 %v1679_v32 }
 0xb3c   :  { %v2191_v1 = vpop.eup %2190 }
 0xb3d   :  { %v1684_v33 = vrot.slane %v2191_v1, %v2442_v28 }
 0xb3f   :  { %v1685_v34 = vmul.f32 %v1684_v33, %v1649_v18  ;;  %v1686_v49 = vmul.f32 %v1684_v33, %v1650_v19  ;;  %v1687_v35 = vmul.f32 %v1684_v33, %v1651_v20  ;;  %v1688_v50 = vmul.f32 %v1684_v33, %v1652_v21 }
 0xb41   :  { %v1695_v53 = vmul.f32 %v1853_v48, %v1685_v34  ;;  %v1696_v51 = vmul.f32 %v1853_v48, %v1686_v49  ;;  %v1697_v54 = vmul.f32 %v1853_v48, %v1687_v35  ;;  %v1698_v55 = vmul.f32 %v1853_v48, %v1688_v50 }
 0xb43   :  { %v1705_v56 = vadd.f32 %v1854_v52, %v1695_v53  ;;  %v1706_v57 = vadd.f32 %v1854_v52, %v1696_v51  ;;  %v1707_v58 = vadd.f32 %v1854_v52, %v1697_v54  ;;  %v1708_v28 = vadd.f32 %v1854_v52, %v1698_v55 }
 0xb45   :  { %v1709_v59 = vmax.f32 %v1705_v56, 0.0  ;;  %v1710_v60 = vmax.f32 %v1706_v57, 0.0  ;;  %v1711_v61 = vmax.f32 %v1707_v58, 0.0  ;;  %v1712_v62 = vmax.f32 %v1708_v28, 0.0 }
 0xb47   :  { %1713 = vst [vmem:[%s2782_s7] sm:$0xff] %v1709_v59  ;;  %1714 = vst [vmem:[%s2782_s7 + $0x8] sm:$0xff] %v1710_v60 }
 0xb48   :  { %1715 = vst [vmem:[%s2782_s7 + $0x10] sm:$0xff] %v1711_v61  ;;  %1716 = vst [vmem:[%s2782_s7 + $0x18] sm:$0xff] %v1712_v62 }

</bundles_post_ra>
